<compile_context>
chip_gen: v6e
topology: v6e:2x2x1
jax: 0.10.0
libtpu: 0.0.40
codegen_flags: <defaults>
</compile_context>

<pallas_src>
import functools

import jax
import jax.numpy as jnp
from jax.experimental import pallas as pl
from jax.experimental.pallas import tpu as pltpu

f32 = jnp.float32
bf16 = jnp.bfloat16
BN_EPS = 1e-5


# ----------------------------------------------------------------------------
# Pallas kernel: tiled matmul, accumulate into the resident output block,
# fused (scale * acc + shift) + LeakyReLU epilogue on the last K step.
# ----------------------------------------------------------------------------
def _mm_fused_kernel(x_ref, w_ref, scale_ref, shift_ref, o_ref, *, slope):
    k = pl.program_id(2)
    acc = jnp.dot(x_ref[...], w_ref[...], preferred_element_type=jnp.float32)

    @pl.when(k == 0)
    def _():
        o_ref[...] = acc

    @pl.when(k > 0)
    def _():
        o_ref[...] += acc

    @pl.when(k == pl.num_programs(2) - 1)
    def _():
        y = o_ref[...] * scale_ref[...] + shift_ref[...]
        o_ref[...] = jnp.where(y >= 0.0, y, slope * y)


def _round_up(x, m):
    return -(-x // m) * m


def _pick_tiles(M, K, N):
    # M (sublane of x / out): multiple of 16 for bf16 sublane packing.
    if M <= 256:
        tm = _round_up(M, 16)            # single M block, minimal padding
    elif M % 256 == 0:
        tm = 256
    else:
        tm = 128
    Mp = _round_up(M, tm)

    # K: full-extent single block when small (DownConv: K = Cin*15), otherwise
    # 2048-wide bf16 chunks streamed with accumulation into o_ref.
    if K <= 2048:
        tk, Kp = K, K
    else:
        tk = 2048
        Kp = _round_up(K, tk)

    # N (lane dim): full extent when small (masked stores are fine at these
    # widths); 256-wide tiles for large Cout.
    if N <= 256:
        tn, Np = N, N
    else:
        tn = 256
        Np = _round_up(N, 256)
    return tm, tk, tn, Mp, Kp, Np


def matmul_fused(x, w, scale, shift, slope):
    """leaky_relu((x @ w) * scale + shift, slope).  x:(M,K), w:(K,N) bf16."""
    M, K = x.shape
    K2, N = w.shape
    assert K == K2
    tm, tk, tn, Mp, Kp, Np = _pick_tiles(M, K, N)

    xb = x.astype(bf16)
    if (Mp, Kp) != (M, K):
        xb = jnp.pad(xb, ((0, Mp - M), (0, Kp - K)))
    wb = w.astype(bf16)
    if (Kp, Np) != (K, N):
        wb = jnp.pad(wb, ((0, Kp - K), (0, Np - N)))
    sc = scale.astype(f32).reshape(1, N)
    sh = shift.astype(f32).reshape(1, N)
    if Np != N:
        sc = jnp.pad(sc, ((0, 0), (0, Np - N)))
        sh = jnp.pad(sh, ((0, 0), (0, Np - N)))

    grid = (Mp // tm, Np // tn, Kp // tk)
    out = pl.pallas_call(
        functools.partial(_mm_fused_kernel, slope=float(slope)),
        out_shape=jax.ShapeDtypeStruct((Mp, Np), f32),
        grid_spec=pltpu.PrefetchScalarGridSpec(
            num_scalar_prefetch=0,
            grid=grid,
            in_specs=[
                pl.BlockSpec((tm, tk), lambda i, j, k: (i, k)),
                pl.BlockSpec((tk, tn), lambda i, j, k: (k, j)),
                pl.BlockSpec((1, tn), lambda i, j, k: (0, j)),
                pl.BlockSpec((1, tn), lambda i, j, k: (0, j)),
            ],
            out_specs=pl.BlockSpec((tm, tn), lambda i, j, k: (i, j)),
        ),
        compiler_params=pltpu.CompilerParams(
            dimension_semantics=("parallel", "parallel", "arbitrary")),
    )(xb, wb, sc, sh)
    if (Mp, Np) != (M, N):
        out = out[:M, :N]
    return out


# ----------------------------------------------------------------------------
# Conv (5,3) pad 1 stride 1  + folded BN + LeakyReLU.  im2col glue in JAX.
# ----------------------------------------------------------------------------
def _im2col_5x3(x, kh=5, kw=3, ph=1, pw=1):
    # x: (N, C, H, W) NCHW -> (N*Hout*Wout, C*kh*kw); K index = c*15 + di*3 + dj
    N, C, H, W = x.shape
    xp = jnp.pad(x, ((0, 0), (0, 0), (ph, ph), (pw, pw)))
    Hout = H + 2 * ph - kh + 1
    Wout = W + 2 * pw - kw + 1
    cols = [xp[:, :, di:di + Hout, dj:dj + Wout]
            for di in range(kh) for dj in range(kw)]
    cols = jnp.stack(cols, axis=2)                       # (N, C, 15, Hout, Wout)
    cols = cols.reshape(N, C * kh * kw, Hout, Wout)
    cols = cols.transpose(0, 2, 3, 1).reshape(N * Hout * Wout, C * kh * kw)
    return cols, Hout, Wout


def conv5x3_bn_lrelu(x, p, slope=0.01):
    """x NCHW f32; p holds pre-folded {'wmat': (K,Cout) bf16, 'scale', 'shift'}."""
    cols, Hout, Wout = _im2col_5x3(x)
    out = matmul_fused(cols, p["wmat"], p["scale"], p["shift"], slope)
    N = x.shape[0]
    Cout = p["wmat"].shape[1]
    return out.reshape(N, Hout, Wout, Cout).transpose(0, 3, 1, 2)


def maxpool2x2(x):
    N, C, H, W = x.shape
    H2, W2 = (H // 2) * 2, (W // 2) * 2
    x = x[:, :, :H2, :W2]
    return x.reshape(N, C, H2 // 2, 2, W2 // 2, 2).max(axis=(3, 5))


def down_conv(x, p, pooling=True):
    x = conv5x3_bn_lrelu(x, p["c1"], slope=0.01)
    x = conv5x3_bn_lrelu(x, p["c2"], slope=0.01)
    if pooling:
        x = maxpool2x2(x)
    return x


# ----------------------------------------------------------------------------
# Parameter init (PyTorch layout) and one-time folding (done OUTSIDE forward).
# ----------------------------------------------------------------------------
def init_downconv_params(key, cin, cout):
    ks = jax.random.split(key, 12)

    def conv_init(kw_, kb_, co, ci, kh, kw):
        fan_in, fan_out = ci * kh * kw, co * kh * kw
        std = (2.0 / (fan_in + fan_out)) ** 0.5
        return {"w": std * jax.random.normal(kw_, (co, ci, kh, kw), f32),
                "b": 0.1 * jax.random.normal(kb_, (co,), f32)}

    def bn_init(k0, k1, k2, k3, c):
        return {"gamma": 0.5 + jax.random.uniform(k0, (c,), f32),
                "beta": 0.1 * jax.random.normal(k1, (c,), f32),
                "mean": 0.1 * jax.random.normal(k2, (c,), f32),
                "var": 0.5 + jax.random.uniform(k3, (c,), f32)}

    return {"conv1": conv_init(ks[0], ks[1], cout, cin, 5, 3),
            "bn1": bn_init(ks[2], ks[3], ks[4], ks[5], cout),
            "conv2": conv_init(ks[6], ks[7], cout, cout, 5, 3),
            "bn2": bn_init(ks[8], ks[9], ks[10], ks[11], cout)}


def _fold_conv_bn(conv_p, bn_p, eps=BN_EPS):
    w, b = conv_p["w"], conv_p["b"]
    Cout, Cin, kh, kw = w.shape
    wmat = w.reshape(Cout, Cin * kh * kw).T.astype(bf16)     # (K, Cout)
    s = bn_p["gamma"] / jnp.sqrt(bn_p["var"] + eps)
    scale = s.reshape(1, Cout).astype(f32)
    shift = ((b - bn_p["mean"]) * s + bn_p["beta"]).reshape(1, Cout).astype(f32)
    return {"wmat": wmat, "scale": scale, "shift": shift}


def prepare_downconv_params(raw):
    return {"c1": _fold_conv_bn(raw["conv1"], raw["bn1"]),
            "c2": _fold_conv_bn(raw["conv2"], raw["bn2"])}


# ----------------------------------------------------------------------------
# Pure-JAX f32 reference (for validation of the Pallas path).
# ----------------------------------------------------------------------------
def ref_down_conv(x, raw, pooling=True):
    def conv_bn_lrelu(x, cp, bnp):
        y = jax.lax.conv_general_dilated(
            x, cp["w"], window_strides=(1, 1), padding=((1, 1), (1, 1)),
            dimension_numbers=("NCHW", "OIHW", "NCHW"),
            precision=jax.lax.Precision.HIGHEST)
        y = y + cp["b"][None, :, None, None]
        g, be, m, v = bnp["gamma"], bnp["beta"], bnp["mean"], bnp["var"]
        y = (y - m[None, :, None, None]) / jnp.sqrt(v[None, :, None, None] + BN_EPS)
        y = g[None, :, None, None] * y + be[None, :, None, None]
        return jnp.where(y >= 0, y, 0.01 * y)

    x = conv_bn_lrelu(x, raw["conv1"], raw["bn1"])
    x = conv_bn_lrelu(x, raw["conv2"], raw["bn2"])
    if pooling:
        x = maxpool2x2(x)
    return x


# ----------------------------------------------------------------------------
if __name__ == "__main__":
    key = jax.random.PRNGKey(0)
    kx, kp = jax.random.split(key)
    Cin, Cout = 4, 32
    x = jax.random.normal(kx, (2, Cin, 20, 16), f32)       # NCHW

    raw = init_downconv_params(kp, Cin, Cout)
    params = prepare_downconv_params(raw)                   # fold/cast ONCE

    fwd = jax.jit(functools.partial(down_conv, pooling=True))
    out = jax.block_until_ready(fwd(x, params))

    # conv1: (2,32,18,16) -> conv2: (2,32,16,16) -> pool: (2,32,8,8)
    assert out.shape == (2, Cout, 8, 8), out.shape
    assert bool(jnp.all(jnp.isfinite(out)))

    ref = jax.block_until_ready(ref_down_conv(x, raw, pooling=True))
    err = float(jnp.max(jnp.abs(out - ref)))
    mag = float(jnp.max(jnp.abs(ref)))
    # bf16 operands + f32 accumulation: loose but meaningful tolerance.
    assert err <= 0.1 + 0.05 * mag, f"mismatch vs reference: {err} (max|ref|={mag})"

    print("KERNEL_OK")
</pallas_src>

<mosaic_0001>
module attributes {stable_mosaic.version = 11 : i64} {
  func.func @_mm_fused_kernel(%arg0: i32, %arg1: i32, %arg2: i32, %arg3: memref<128x60xbf16, #tpu.memory_space<vmem>>, %arg4: memref<60x32xbf16, #tpu.memory_space<vmem>>, %arg5: memref<1x32xf32, #tpu.memory_space<vmem>>, %arg6: memref<1x32xf32, #tpu.memory_space<vmem>>, %arg7: memref<128x32xf32, #tpu.memory_space<vmem>>) attributes {dimension_semantics = [#tpu.dimension_semantics<parallel>, #tpu.dimension_semantics<parallel>, #tpu.dimension_semantics<arbitrary>], iteration_bounds = array<i64: 5, 1, 1>, scalar_prefetch = 0 : i64, scratch_operands = 0 : i64, tpu.core_type = #tpu.core_type<tc>, window_params = [{transform_indices = @transform_0, window_bounds = array<i64: 128, 60>}, {transform_indices = @transform_1, window_bounds = array<i64: 60, 32>}, {transform_indices = @transform_2, window_bounds = array<i64: 1, 32>}, {transform_indices = @transform_3, window_bounds = array<i64: 1, 32>}, {transform_indices = @transform_4, window_bounds = array<i64: 128, 32>}]} {
    %c0 = arith.constant 0 : index
    %c0_0 = arith.constant 0 : index
    %0 = vector.load %arg3[%c0, %c0_0] : memref<128x60xbf16, #tpu.memory_space<vmem>>, vector<128x60xbf16>
    %c0_1 = arith.constant 0 : index
    %c0_2 = arith.constant 0 : index
    %1 = vector.load %arg4[%c0_1, %c0_2] : memref<60x32xbf16, #tpu.memory_space<vmem>>, vector<60x32xbf16>
    %cst = arith.constant dense<0.000000e+00> : vector<128x32xf32>
    %2 = tpu.matmul %0, %1, %cst {dimension_numbers = #tpu.dot_dimension_numbers<[1], [0], [0], [1], [0, 0, 1, 1], [], []>} : vector<128x60xbf16>, vector<60x32xbf16>, vector<128x32xf32> -> vector<128x32xf32>
    %c0_i32 = arith.constant 0 : i32
    %3 = arith.cmpi eq, %arg2, %c0_i32 : i32
    %4 = arith.extui %3 : i1 to i32
    %c0_i32_3 = arith.constant 0 : i32
    %5 = arith.cmpi ne, %4, %c0_i32_3 : i32
    scf.if %5 {
      %c0_8 = arith.constant 0 : index
      %c0_9 = arith.constant 0 : index
      %12 = vector.load %arg7[%c0_8, %c0_9] : memref<128x32xf32, #tpu.memory_space<vmem>>, vector<128x32xf32>
      tpu.vector_store %arg7[%c0_8, %c0_9], %2 {strides = array<i32>} : memref<128x32xf32, #tpu.memory_space<vmem>>, vector<128x32xf32>,
    } else {
    }
    %c0_i32_4 = arith.constant 0 : i32
    %6 = arith.cmpi sgt, %arg2, %c0_i32_4 : i32
    %7 = arith.extui %6 : i1 to i32
    %c0_i32_5 = arith.constant 0 : i32
    %8 = arith.cmpi ne, %7, %c0_i32_5 : i32
    scf.if %8 {
      %c0_8 = arith.constant 0 : index
      %c0_9 = arith.constant 0 : index
      %12 = vector.load %arg7[%c0_8, %c0_9] : memref<128x32xf32, #tpu.memory_space<vmem>>, vector<128x32xf32>
      %13 = arith.addf %12, %2 : vector<128x32xf32>
      %c0_10 = arith.constant 0 : index
      %c0_11 = arith.constant 0 : index
      %14 = vector.load %arg7[%c0_10, %c0_11] : memref<128x32xf32, #tpu.memory_space<vmem>>, vector<128x32xf32>
      tpu.vector_store %arg7[%c0_10, %c0_11], %13 {strides = array<i32>} : memref<128x32xf32, #tpu.memory_space<vmem>>, vector<128x32xf32>,
    } else {
    }
    %c0_i32_6 = arith.constant 0 : i32
    %9 = arith.cmpi eq, %arg2, %c0_i32_6 : i32
    %10 = arith.extui %9 : i1 to i32
    %c0_i32_7 = arith.constant 0 : i32
    %11 = arith.cmpi ne, %10, %c0_i32_7 : i32
    scf.if %11 {
      %c0_8 = arith.constant 0 : index
      %c0_9 = arith.constant 0 : index
      %12 = vector.load %arg7[%c0_8, %c0_9] : memref<128x32xf32, #tpu.memory_space<vmem>>, vector<128x32xf32>
      %c0_10 = arith.constant 0 : index
      %c0_11 = arith.constant 0 : index
      %13 = vector.load %arg5[%c0_10, %c0_11] : memref<1x32xf32, #tpu.memory_space<vmem>>, vector<1x32xf32>
      %14 = vector.broadcast %13 : vector<1x32xf32> to vector<128x32xf32>
      %15 = arith.mulf %12, %14 : vector<128x32xf32>
      %c0_12 = arith.constant 0 : index
      %c0_13 = arith.constant 0 : index
      %16 = vector.load %arg6[%c0_12, %c0_13] : memref<1x32xf32, #tpu.memory_space<vmem>>, vector<1x32xf32>
      %17 = vector.broadcast %16 : vector<1x32xf32> to vector<128x32xf32>
      %18 = arith.addf %15, %17 : vector<128x32xf32>
      %cst_14 = arith.constant 0.000000e+00 : f32
      %19 = vector.broadcast %cst_14 : f32 to vector<128x32xf32>
      %20 = arith.cmpf oge, %18, %19 : vector<128x32xf32>
      %cst_15 = arith.constant 0.00999999977 : f32
      %21 = vector.broadcast %cst_15 : f32 to vector<128x32xf32>
      %22 = arith.mulf %21, %18 : vector<128x32xf32>
      %23 = arith.select %20, %18, %22 : vector<128x32xi1>, vector<128x32xf32>
      %c0_16 = arith.constant 0 : index
      %c0_17 = arith.constant 0 : index
      %24 = vector.load %arg7[%c0_16, %c0_17] : memref<128x32xf32, #tpu.memory_space<vmem>>, vector<128x32xf32>
      tpu.vector_store %arg7[%c0_16, %c0_17], %23 {strides = array<i32>} : memref<128x32xf32, #tpu.memory_space<vmem>>, vector<128x32xf32>,
    } else {
    }
    return
  }
  func.func @transform_0(%arg0: i32, %arg1: i32, %arg2: i32) -> (i32, i32) {
    %c0_i32 = arith.constant 0 : i32
    return %arg0, %arg2 : i32, i32
  }
  func.func @transform_1(%arg0: i32, %arg1: i32, %arg2: i32) -> (i32, i32) {
    %c0_i32 = arith.constant 0 : i32
    return %arg2, %arg1 : i32, i32
  }
  func.func @transform_2(%arg0: i32, %arg1: i32, %arg2: i32) -> (i32, i32) {
    %c0_i32 = arith.constant 0 : i32
    %c0_i32_0 = arith.constant 0 : i32
    return %c0_i32, %arg1 : i32, i32
  }
  func.func @transform_3(%arg0: i32, %arg1: i32, %arg2: i32) -> (i32, i32) {
    %c0_i32 = arith.constant 0 : i32
    %c0_i32_0 = arith.constant 0 : i32
    return %c0_i32, %arg1 : i32, i32
  }
  func.func @transform_4(%arg0: i32, %arg1: i32, %arg2: i32) -> (i32, i32) {
    %c0_i32 = arith.constant 0 : i32
    return %arg0, %arg1 : i32, i32
  }
}

module attributes {stable_mosaic.version = 11 : i64} {
  func.func @_mm_fused_kernel(%arg0: i32, %arg1: i32, %arg2: i32, %arg3: memref<256x480xbf16, #tpu.memory_space<vmem>>, %arg4: memref<480x32xbf16, #tpu.memory_space<vmem>>, %arg5: memref<1x32xf32, #tpu.memory_space<vmem>>, %arg6: memref<1x32xf32, #tpu.memory_space<vmem>>, %arg7: memref<256x32xf32, #tpu.memory_space<vmem>>) attributes {dimension_semantics = [#tpu.dimension_semantics<parallel>, #tpu.dimension_semantics<parallel>, #tpu.dimension_semantics<arbitrary>], iteration_bounds = array<i64: 2, 1, 1>, scalar_prefetch = 0 : i64, scratch_operands = 0 : i64, tpu.core_type = #tpu.core_type<tc>, window_params = [{transform_indices = @transform_0, window_bounds = array<i64: 256, 480>}, {transform_indices = @transform_1, window_bounds = array<i64: 480, 32>}, {transform_indices = @transform_2, window_bounds = array<i64: 1, 32>}, {transform_indices = @transform_3, window_bounds = array<i64: 1, 32>}, {transform_indices = @transform_4, window_bounds = array<i64: 256, 32>}]} {
    %c0 = arith.constant 0 : index
    %c0_0 = arith.constant 0 : index
    %0 = vector.load %arg3[%c0, %c0_0] : memref<256x480xbf16, #tpu.memory_space<vmem>>, vector<256x480xbf16>
    %c0_1 = arith.constant 0 : index
    %c0_2 = arith.constant 0 : index
    %1 = vector.load %arg4[%c0_1, %c0_2] : memref<480x32xbf16, #tpu.memory_space<vmem>>, vector<480x32xbf16>
    %cst = arith.constant dense<0.000000e+00> : vector<256x32xf32>
    %2 = tpu.matmul %0, %1, %cst {dimension_numbers = #tpu.dot_dimension_numbers<[1], [0], [0], [1], [0, 0, 1, 1], [], []>} : vector<256x480xbf16>, vector<480x32xbf16>, vector<256x32xf32> -> vector<256x32xf32>
    %c0_i32 = arith.constant 0 : i32
    %3 = arith.cmpi eq, %arg2, %c0_i32 : i32
    %4 = arith.extui %3 : i1 to i32
    %c0_i32_3 = arith.constant 0 : i32
    %5 = arith.cmpi ne, %4, %c0_i32_3 : i32
    scf.if %5 {
      %c0_8 = arith.constant 0 : index
      %c0_9 = arith.constant 0 : index
      %12 = vector.load %arg7[%c0_8, %c0_9] : memref<256x32xf32, #tpu.memory_space<vmem>>, vector<256x32xf32>
      tpu.vector_store %arg7[%c0_8, %c0_9], %2 {strides = array<i32>} : memref<256x32xf32, #tpu.memory_space<vmem>>, vector<256x32xf32>,
    } else {
    }
    %c0_i32_4 = arith.constant 0 : i32
    %6 = arith.cmpi sgt, %arg2, %c0_i32_4 : i32
    %7 = arith.extui %6 : i1 to i32
    %c0_i32_5 = arith.constant 0 : i32
    %8 = arith.cmpi ne, %7, %c0_i32_5 : i32
    scf.if %8 {
      %c0_8 = arith.constant 0 : index
      %c0_9 = arith.constant 0 : index
      %12 = vector.load %arg7[%c0_8, %c0_9] : memref<256x32xf32, #tpu.memory_space<vmem>>, vector<256x32xf32>
      %13 = arith.addf %12, %2 : vector<256x32xf32>
      %c0_10 = arith.constant 0 : index
      %c0_11 = arith.constant 0 : index
      %14 = vector.load %arg7[%c0_10, %c0_11] : memref<256x32xf32, #tpu.memory_space<vmem>>, vector<256x32xf32>
      tpu.vector_store %arg7[%c0_10, %c0_11], %13 {strides = array<i32>} : memref<256x32xf32, #tpu.memory_space<vmem>>, vector<256x32xf32>,
    } else {
    }
    %c0_i32_6 = arith.constant 0 : i32
    %9 = arith.cmpi eq, %arg2, %c0_i32_6 : i32
    %10 = arith.extui %9 : i1 to i32
    %c0_i32_7 = arith.constant 0 : i32
    %11 = arith.cmpi ne, %10, %c0_i32_7 : i32
    scf.if %11 {
      %c0_8 = arith.constant 0 : index
      %c0_9 = arith.constant 0 : index
      %12 = vector.load %arg7[%c0_8, %c0_9] : memref<256x32xf32, #tpu.memory_space<vmem>>, vector<256x32xf32>
      %c0_10 = arith.constant 0 : index
      %c0_11 = arith.constant 0 : index
      %13 = vector.load %arg5[%c0_10, %c0_11] : memref<1x32xf32, #tpu.memory_space<vmem>>, vector<1x32xf32>
      %14 = vector.broadcast %13 : vector<1x32xf32> to vector<256x32xf32>
      %15 = arith.mulf %12, %14 : vector<256x32xf32>
      %c0_12 = arith.constant 0 : index
      %c0_13 = arith.constant 0 : index
      %16 = vector.load %arg6[%c0_12, %c0_13] : memref<1x32xf32, #tpu.memory_space<vmem>>, vector<1x32xf32>
      %17 = vector.broadcast %16 : vector<1x32xf32> to vector<256x32xf32>
      %18 = arith.addf %15, %17 : vector<256x32xf32>
      %cst_14 = arith.constant 0.000000e+00 : f32
      %19 = vector.broadcast %cst_14 : f32 to vector<256x32xf32>
      %20 = arith.cmpf oge, %18, %19 : vector<256x32xf32>
      %cst_15 = arith.constant 0.00999999977 : f32
      %21 = vector.broadcast %cst_15 : f32 to vector<256x32xf32>
      %22 = arith.mulf %21, %18 : vector<256x32xf32>
      %23 = arith.select %20, %18, %22 : vector<256x32xi1>, vector<256x32xf32>
      %c0_16 = arith.constant 0 : index
      %c0_17 = arith.constant 0 : index
      %24 = vector.load %arg7[%c0_16, %c0_17] : memref<256x32xf32, #tpu.memory_space<vmem>>, vector<256x32xf32>
      tpu.vector_store %arg7[%c0_16, %c0_17], %23 {strides = array<i32>} : memref<256x32xf32, #tpu.memory_space<vmem>>, vector<256x32xf32>,
    } else {
    }
    return
  }
  func.func @transform_0(%arg0: i32, %arg1: i32, %arg2: i32) -> (i32, i32) {
    %c0_i32 = arith.constant 0 : i32
    return %arg0, %arg2 : i32, i32
  }
  func.func @transform_1(%arg0: i32, %arg1: i32, %arg2: i32) -> (i32, i32) {
    %c0_i32 = arith.constant 0 : i32
    return %arg2, %arg1 : i32, i32
  }
  func.func @transform_2(%arg0: i32, %arg1: i32, %arg2: i32) -> (i32, i32) {
    %c0_i32 = arith.constant 0 : i32
    %c0_i32_0 = arith.constant 0 : i32
    return %c0_i32, %arg1 : i32, i32
  }
  func.func @transform_3(%arg0: i32, %arg1: i32, %arg2: i32) -> (i32, i32) {
    %c0_i32 = arith.constant 0 : i32
    %c0_i32_0 = arith.constant 0 : i32
    return %c0_i32, %arg1 : i32, i32
  }
  func.func @transform_4(%arg0: i32, %arg1: i32, %arg2: i32) -> (i32, i32) {
    %c0_i32 = arith.constant 0 : i32
    return %arg0, %arg1 : i32, i32
  }
}

</mosaic_0001>

<bundles_post_ra>
// kernel: down_conv.2
= control target key start
LH: loop header
LB: loop body
LE: loop exit
PB: predicated region body
PF: predicated region fallthrough
CT: control target
= control target key end

     0   :  { %s1008_s15 = smov 0   ;;  %s1010_s16 = smov 0   ;;  %s1189_s0 = inlined_call_operand.vmem [shape: bf16[640,60], index: 0, kind: input, shape index: {}]   ;;  %s1190_s1 = inlined_call_operand.vmem [shape: bf16[60,32], index: 1, kind: input, shape index: {}]   ;;  %s1191_s2 = inlined_call_operand.vmem [shape: f32[1,32], index: 2, kind: input, shape index: {}]   ;;  %s1192_s3 = inlined_call_operand.vmem [shape: f32[1,32], index: 3, kind: input, shape index: {}]   ;;  %s1193_s4 = inlined_call_operand.vmem [shape: f32[640,32], index: 4, kind: output, shape index: {}]  }
   0x1   :  { %s1012_s17 = smov 0  }
   0x2 LB: > { %s33_s18 = sadd.s32 1, %s977_s16  ;;  %p848_p0 = scmp.ge.s32.totalorder %s981_s17, 1  ;;  %s981_s17 = sphi %s1012_s17, %s14_s17   ;;  %s977_s16 = sphi %s1010_s16, %s1195_s16   ;;  %s973_s15 = sphi %s1008_s15, %s1194_s15  }
   0x3   : > { %p35_p1 = scmp.ge.s32.totalorder %s33_s18, 5  ;;  %p221_p2 = scmp.lt.s32.totalorder %s981_s17, 6 }
   0x5   : > { %s1197_s18 = smov (%p35_p1, %s33_s18), 0  ;;  %p222_p3 = pnand %p848_p0, %p221_p2 }
   0x6   : > { %s849_s23 = sshll.u32 (!%p222_p3), %s973_s15, 4 }
   0x7   : > { %225 = sbr.rel (%p222_p3) target bundleno = 256 (0x100), region = 36  ;;  %p268_p4 = scmp.lt.s32.totalorder (!%p222_p3), %s849_s23, 79 }
   0xc   : > { %v947_v0 = vld [vmem:[%s1190_s1 + $0x18] sm:$0x3f]   ;;  %vm413_vm0 = vcmask 1045504   ;;  %v948_v1 = vld [vmem:[%s1190_s1 + $0x10] sm:$0xff]   ;;  %v949_v3 = vld [vmem:[%s1190_s1 + $0x8] sm:$0xff]   ;;  %s1199_s23 = smov (!%p268_p4, %s849_s23), 79 }
   0xd   : > { %921 = vmatprep.subr.msk.bf16.mxu0 %vm413_vm0, %v947_v0  ;;  %922 = vmatprep.subr.msk.bf16.mxu1 %vm413_vm0, %v947_v0  ;;  %v415_v2 = vsel %vm413_vm0, %v947_v0, 0  ;;  %v950_v4 = vld [vmem:[%s1190_s1] sm:$0xff]   ;;  %s850_s28 = sshll.u32 %s1199_s23, 2  ;;  %vm388_vm1 = vcmask 490496   ;;  %s852_s6 = sshll.u32 %s1199_s23, 3  ;;  %vm518_vm2 = vcmask 261120  }
   0xe   : > { %890 = vmatpush3.bf16.msra.mxu0 %v415_v2  ;;  %917 = vmatpush3.bf16.msra.mxu1 %v415_v2  ;;  %s274_s5 = scalar_lea.vmem %s1189_s0, %s850_s28  ;;  %s1056_s9 = scalar_lea.vmem %s1193_s4, %s852_s6  ;;  %v1073_v19 = vld [vmem:[%s1191_s2] ss:$0 sm:$0xff] }
   0xf   : > { %891 = vmatprep.subr.bf16.mxu0 %v948_v1  ;;  %914 = vmatprep.subr.bf16.mxu1 %v948_v1  ;;  %v951_v5 = vld [vmem:[%s274_s5] sm:$0xff]   ;;  %v953_v7 = vld [vmem:[%s274_s5 + $0x8] sm:$0xff]   ;;  %v955_v9 = vld [vmem:[%s274_s5 + $0x10] sm:$0xff]  }
  0x10   : > { %v952_v6 = vld [vmem:[%s274_s5 + $0x20] sm:$0xff]   ;;  %897 = vmatprep.mubr.msk.bf16.mxu0 %vm388_vm1, %v951_v5  ;;  %v954_v8 = vld [vmem:[%s274_s5 + $0x28] sm:$0xff]   ;;  %v956_v10 = vld [vmem:[%s274_s5 + $0x30] sm:$0xff]  }
  0x11   : > { %905 = vmatprep.mubr.msk.bf16.mxu1 %vm388_vm1, %v952_v6  ;;  %v957_v11 = vld [vmem:[%s274_s5 + $0x18] sm:$0xff]   ;;  %v1083_v23 = vld [vmem:[%s1192_s3] ss:$0 sm:$0xff] }
  0x12   : > { %892 = vmatpush3.bf16.msra.mxu0 %v948_v1  ;;  %918 = vmatpush3.bf16.msra.mxu1 %v948_v1  ;;  %v958_v12 = vld [vmem:[%s274_s5 + $0x38] sm:$0xff]  }
  0x13   : > { %893 = vmatprep.subr.bf16.mxu0 %v949_v3  ;;  %915 = vmatprep.subr.bf16.mxu1 %v949_v3 }
  0x16   : > { %894 = vmatpush3.bf16.msra.mxu0 %v949_v3  ;;  %919 = vmatpush3.bf16.msra.mxu1 %v949_v3 }
  0x17   : > { %895 = vmatprep.subr.bf16.mxu0 %v950_v4  ;;  %916 = vmatprep.subr.bf16.mxu1 %v950_v4 }
  0x1a   : > { %896 = vmatpush3.bf16.msra.mxu0 %v950_v4  ;;  %920 = vmatpush3.bf16.msra.mxu1 %v950_v4 }
  0x1d   : > { %898 = vmatmul.mubr.msk.bf16.vlgmr.msra.gmra.mxu0 %vm388_vm1, %v953_v7  ;;  %906 = vmatmul.mubr.msk.bf16.vlgmr.msra.gmra.mxu1 %vm388_vm1, %v954_v8 }
  0x1e   : > { %901 = vmatprep.mubr.msk.bf16.mxu0 %vm388_vm1, %v955_v9  ;;  %909 = vmatprep.mubr.msk.bf16.mxu1 %vm388_vm1, %v956_v10 }
  0x25   : > { %902 = vmatmul.mubr.msk.bf16.gmra.mxu0 %vm388_vm1, %v957_v11  ;;  %910 = vmatmul.mubr.msk.bf16.gmra.mxu1 %vm388_vm1, %v958_v12 }
  0xdd   : > { %v899_v13 = vpop.f32.mrf.mxu0  ;;  %v907_v14 = vpop.f32.mrf.mxu1 }
  0xde   : > { %521 = vst.msk [vmem:[%s1056_s9 + $0x10] sm:$0xff] %vm518_vm2, %v899_v13  ;;  %529 = vst.msk [vmem:[%s1056_s9 + $0x50] sm:$0xff] %vm518_vm2, %v907_v14 }
  0xdf   : > { %v451_v15 = vpop.f32.mrf.mxu0  ;;  %v483_v16 = vpop.f32.mrf.mxu1 }
  0xe0   : > { %519 = vst.msk [vmem:[%s1056_s9] sm:$0xff] %vm518_vm2, %v451_v15  ;;  %527 = vst.msk [vmem:[%s1056_s9 + $0x40] sm:$0xff] %vm518_vm2, %v483_v16 }
  0xe1   : > { %v900_v17 = vpop.f32.mrf.mxu0  ;;  %v908_v18 = vpop.f32.mrf.mxu1 }
  0xe2   : > { %522 = vst.msk [vmem:[%s1056_s9 + $0x18] sm:$0xff] %vm518_vm2, %v900_v17  ;;  %530 = vst.msk [vmem:[%s1056_s9 + $0x58] sm:$0xff] %vm518_vm2, %v908_v18 }
  0xe3   : > { %v454_v20 = vpop.f32.mrf.mxu0  ;;  %v486_v21 = vpop.f32.mrf.mxu1 }
  0xe4   : > { %520 = vst.msk [vmem:[%s1056_s9 + $0x8] sm:$0xff] %vm518_vm2, %v454_v20  ;;  %528 = vst.msk [vmem:[%s1056_s9 + $0x48] sm:$0xff] %vm518_vm2, %v486_v21 }
  0xe5   : > { %v593_v22 = vld [vmem:[%s1056_s9 + $0x10] sm:$0xff]  ;;  %v903_v25 = vpop.f32.mrf.mxu0  ;;  %v911_v26 = vpop.f32.mrf.mxu1 }
  0xe6   : > { %v601_v24 = vld [vmem:[%s1056_s9 + $0x50] sm:$0xff]  ;;  %v616_v27 = vmul.f32 %v1073_v19, %v593_v22  ;;  %525 = vst.msk [vmem:[%s1056_s9 + $0x30] sm:$0xff] %vm518_vm2, %v903_v25  ;;  %533 = vst.msk [vmem:[%s1056_s9 + $0x70] sm:$0xff] %vm518_vm2, %v911_v26 }
  0xe7   : > { %v624_v28 = vmul.f32 %v1073_v19, %v601_v24  ;;  %v591_v29 = vld [vmem:[%s1056_s9] sm:$0xff]  ;;  %v467_v31 = vpop.f32.mrf.mxu0  ;;  %v499_v32 = vpop.f32.mrf.mxu1 }
  0xe8   : > { %v599_v30 = vld [vmem:[%s1056_s9 + $0x40] sm:$0xff]  ;;  %v639_v33 = vadd.f32 %v1083_v23, %v616_v27  ;;  %v614_v35 = vmul.f32 %v1073_v19, %v591_v29  ;;  %523 = vst.msk [vmem:[%s1056_s9 + $0x20] sm:$0xff] %vm518_vm2, %v467_v31  ;;  %531 = vst.msk [vmem:[%s1056_s9 + $0x60] sm:$0xff] %vm518_vm2, %v499_v32 }
  0xe9   : > { %v647_v34 = vadd.f32 %v1083_v23, %v624_v28  ;;  %v622_v36 = vmul.f32 %v1073_v19, %v599_v30  ;;  %v594_v37 = vld [vmem:[%s1056_s9 + $0x18] sm:$0xff]  ;;  %v904_v39 = vpop.f32.mrf.mxu0  ;;  %v912_v40 = vpop.f32.mrf.mxu1 }
  0xea   : > { %v602_v38 = vld [vmem:[%s1056_s9 + $0x58] sm:$0xff]  ;;  %vm655_vm3 = vcmp.ge.f32.partialorder %v639_v33, 0.0  ;;  %v671_v41 = vmul.f32 0.01, %v639_v33  ;;  %526 = vst.msk [vmem:[%s1056_s9 + $0x38] sm:$0xff] %vm518_vm2, %v904_v39  ;;  %534 = vst.msk [vmem:[%s1056_s9 + $0x78] sm:$0xff] %vm518_vm2, %v912_v40  ;;  %v637_v43 = vadd.f32 %v1083_v23, %v614_v35  ;;  %v617_v45 = vmul.f32 %v1073_v19, %v594_v37 }
  0xeb   : > { %vm663_vm4 = vcmp.ge.f32.partialorder %v647_v34, 0.0  ;;  %v679_v42 = vmul.f32 0.01, %v647_v34  ;;  %v645_v44 = vadd.f32 %v1083_v23, %v622_v36  ;;  %v625_v46 = vmul.f32 %v1073_v19, %v602_v38  ;;  %v592_v47 = vld [vmem:[%s1056_s9 + $0x8] sm:$0xff]  ;;  %v470_v49 = vpop.f32.mrf.mxu0  ;;  %v502_v50 = vpop.f32.mrf.mxu1 }
  0xec   : > { %v600_v48 = vld [vmem:[%s1056_s9 + $0x48] sm:$0xff]  ;;  %v687_v51 = vsel %vm655_vm3, %v639_v33, %v671_v41  ;;  %v615_v53 = vmul.f32 %v1073_v19, %v592_v47  ;;  %524 = vst.msk [vmem:[%s1056_s9 + $0x28] sm:$0xff] %vm518_vm2, %v470_v49  ;;  %532 = vst.msk [vmem:[%s1056_s9 + $0x68] sm:$0xff] %vm518_vm2, %v502_v50  ;;  %vm653_vm5 = vcmp.ge.f32.partialorder %v637_v43, 0.0  ;;  %v669_v55 = vmul.f32 0.01, %v637_v43 }
  0xed   : > { %v695_v52 = vsel %vm663_vm4, %v647_v34, %v679_v42  ;;  %v623_v54 = vmul.f32 %v1073_v19, %v600_v48  ;;  %704 = vst.msk [vmem:[%s1056_s9 + $0x10] sm:$0xff] %vm518_vm2, %v687_v51  ;;  %vm661_vm6 = vcmp.ge.f32.partialorder %v645_v44, 0.0  ;;  %v677_v56 = vmul.f32 0.01, %v645_v44  ;;  %v597_v61 = vld [vmem:[%s1056_s9 + $0x30] sm:$0xff] }
  0xee   : > { %712 = vst.msk [vmem:[%s1056_s9 + $0x50] sm:$0xff] %vm518_vm2, %v695_v52  ;;  %v640_v57 = vadd.f32 %v1083_v23, %v617_v45  ;;  %v648_v58 = vadd.f32 %v1083_v23, %v625_v46  ;;  %v638_v59 = vadd.f32 %v1083_v23, %v615_v53  ;;  %v605_v62 = vld [vmem:[%s1056_s9 + $0x70] sm:$0xff]  ;;  %v685_v63 = vsel %vm653_vm5, %v637_v43, %v669_v55 }
  0xef   : > { %v646_v60 = vadd.f32 %v1083_v23, %v623_v54  ;;  %v693_v0 = vsel %vm661_vm6, %v645_v44, %v677_v56  ;;  %v620_v1 = vmul.f32 %v1073_v19, %v597_v61  ;;  %v628_v2 = vmul.f32 %v1073_v19, %v605_v62  ;;  %v595_v3 = vld [vmem:[%s1056_s9 + $0x20] sm:$0xff]  ;;  %702 = vst.msk [vmem:[%s1056_s9] sm:$0xff] %vm518_vm2, %v685_v63 }
  0xf0   : > { %v603_v4 = vld [vmem:[%s1056_s9 + $0x60] sm:$0xff]  ;;  %710 = vst.msk [vmem:[%s1056_s9 + $0x40] sm:$0xff] %vm518_vm2, %v693_v0  ;;  %vm656_vm7 = vcmp.ge.f32.partialorder %v640_v57, 0.0  ;;  %v672_v5 = vmul.f32 0.01, %v640_v57  ;;  %vm664_vm8 = vcmp.ge.f32.partialorder %v648_v58, 0.0  ;;  %v618_v17 = vmul.f32 %v1073_v19, %v595_v3 }
  0xf1   : > { %v680_v6 = vmul.f32 0.01, %v648_v58  ;;  %vm654_vm9 = vcmp.ge.f32.partialorder %v638_v59, 0.0  ;;  %v670_v7 = vmul.f32 0.01, %v638_v59  ;;  %vm662_vm10 = vcmp.ge.f32.partialorder %v646_v60, 0.0 }
  0xf2   : > { %v678_v8 = vmul.f32 0.01, %v646_v60  ;;  %v688_v9 = vsel %vm656_vm7, %v640_v57, %v672_v5  ;;  %v643_v11 = vadd.f32 %v1083_v23, %v620_v1  ;;  %v651_v12 = vadd.f32 %v1083_v23, %v628_v2  ;;  %v598_v13 = vld [vmem:[%s1056_s9 + $0x38] sm:$0xff] }
  0xf3   : > { %v696_v10 = vsel %vm664_vm8, %v648_v58, %v680_v6  ;;  %v606_v14 = vld [vmem:[%s1056_s9 + $0x78] sm:$0xff]  ;;  %705 = vst.msk [vmem:[%s1056_s9 + $0x18] sm:$0xff] %vm518_vm2, %v688_v9  ;;  %v686_v15 = vsel %vm654_vm9, %v638_v59, %v670_v7  ;;  %v626_v18 = vmul.f32 %v1073_v19, %v603_v4  ;;  %v596_v20 = vld [vmem:[%s1056_s9 + $0x28] sm:$0xff]  ;;  %v641_v25 = vadd.f32 %v1083_v23, %v618_v17 }
  0xf4   : > { %713 = vst.msk [vmem:[%s1056_s9 + $0x58] sm:$0xff] %vm518_vm2, %v696_v10  ;;  %v694_v16 = vsel %vm662_vm10, %v646_v60, %v678_v8  ;;  %v604_v21 = vld [vmem:[%s1056_s9 + $0x68] sm:$0xff]  ;;  %703 = vst.msk [vmem:[%s1056_s9 + $0x8] sm:$0xff] %vm518_vm2, %v686_v15  ;;  %vm659_vm11 = vcmp.ge.f32.partialorder %v643_v11, 0.0  ;;  %v675_v22 = vmul.f32 0.01, %v643_v11  ;;  %v621_v27 = vmul.f32 %v1073_v19, %v598_v13 }
  0xf5   : > { %711 = vst.msk [vmem:[%s1056_s9 + $0x48] sm:$0xff] %vm518_vm2, %v694_v16  ;;  %vm667_vm12 = vcmp.ge.f32.partialorder %v651_v12, 0.0  ;;  %v683_v24 = vmul.f32 0.01, %v651_v12  ;;  %v649_v26 = vadd.f32 %v1083_v23, %v626_v18  ;;  %v629_v28 = vmul.f32 %v1073_v19, %v606_v14 }
  0xf6   : > { %v691_v29 = vsel %vm659_vm11, %v643_v11, %v675_v22  ;;  %v619_v31 = vmul.f32 %v1073_v19, %v596_v20  ;;  %v627_v32 = vmul.f32 %v1073_v19, %v604_v21  ;;  %vm657_vm13 = vcmp.ge.f32.partialorder %v641_v25, 0.0 }
  0xf7   : > { %v699_v30 = vsel %vm667_vm12, %v651_v12, %v683_v24  ;;  %708 = vst.msk [vmem:[%s1056_s9 + $0x30] sm:$0xff] %vm518_vm2, %v691_v29  ;;  %v673_v33 = vmul.f32 0.01, %v641_v25  ;;  %vm665_vm14 = vcmp.ge.f32.partialorder %v649_v26, 0.0  ;;  %v681_v34 = vmul.f32 0.01, %v649_v26 }
  0xf8   : > { %716 = vst.msk [vmem:[%s1056_s9 + $0x70] sm:$0xff] %vm518_vm2, %v699_v30  ;;  %v644_v35 = vadd.f32 %v1083_v23, %v621_v27  ;;  %v652_v36 = vadd.f32 %v1083_v23, %v629_v28  ;;  %v642_v37 = vadd.f32 %v1083_v23, %v619_v31  ;;  %v650_v38 = vadd.f32 %v1083_v23, %v627_v32 }
  0xf9   : > { %v689_v39 = vsel %vm657_vm13, %v641_v25, %v673_v33  ;;  %v697_v19 = vsel %vm665_vm14, %v649_v26, %v681_v34 }
  0xfa   : > { %706 = vst.msk [vmem:[%s1056_s9 + $0x20] sm:$0xff] %vm518_vm2, %v689_v39  ;;  %714 = vst.msk [vmem:[%s1056_s9 + $0x60] sm:$0xff] %vm518_vm2, %v697_v19  ;;  %vm660_vm15 = vcmp.ge.f32.partialorder %v644_v35, 0.0  ;;  %v676_v40 = vmul.f32 0.01, %v644_v35  ;;  %vm668_vm0 = vcmp.ge.f32.partialorder %v652_v36, 0.0 }
  0xfb   : > { %v684_v41 = vmul.f32 0.01, %v652_v36  ;;  %vm658_vm1 = vcmp.ge.f32.partialorder %v642_v37, 0.0  ;;  %v674_v42 = vmul.f32 0.01, %v642_v37  ;;  %vm666_vm3 = vcmp.ge.f32.partialorder %v650_v38, 0.0 }
  0xfc   : > { %v682_v43 = vmul.f32 0.01, %v650_v38  ;;  %v692_v44 = vsel %vm660_vm15, %v644_v35, %v676_v40 }
  0xfd   : > { %v700_v45 = vsel %vm668_vm0, %v652_v36, %v684_v41  ;;  %709 = vst.msk [vmem:[%s1056_s9 + $0x38] sm:$0xff] %vm518_vm2, %v692_v44  ;;  %v690_v23 = vsel %vm658_vm1, %v642_v37, %v674_v42 }
  0xfe   : > { %717 = vst.msk [vmem:[%s1056_s9 + $0x78] sm:$0xff] %vm518_vm2, %v700_v45  ;;  %v698_v46 = vsel %vm666_vm3, %v650_v38, %v682_v43  ;;  %707 = vst.msk [vmem:[%s1056_s9 + $0x28] sm:$0xff] %vm518_vm2, %v690_v23 }
  0xff   : > { %715 = vst.msk [vmem:[%s1056_s9 + $0x68] sm:$0xff] %vm518_vm2, %v698_v46 }
 0x100 PF: > { %s14_s17 = sadd.s32 1, %s981_s17   ;;  %s1194_s15 = smov %s977_s16 }
 0x101   : > { %p11_p5 = scmp.ge.s32.totalorder %s14_s17, 7   ;;  %s1195_s16 = smov %s1197_s18 }
 0x103   :  { %13 = sbr.rel (!%p11_p5) target bundleno = 2 (0x2), region = 87 }

// kernel: down_conv.3
= control target key start
LH: loop header
LB: loop body
LE: loop exit
PB: predicated region body
PF: predicated region fallthrough
CT: control target
= control target key end

     0   :  { %s2263_s15 = smov 0   ;;  %s2265_s16 = smov 0   ;;  %s2785_s0 = inlined_call_operand.vmem [shape: bf16[512,480], index: 0, kind: input, shape index: {}]   ;;  %s2786_s1 = inlined_call_operand.vmem [shape: bf16[480,32], index: 1, kind: input, shape index: {}]   ;;  %s2787_s2 = inlined_call_operand.vmem [shape: f32[1,32], index: 2, kind: input, shape index: {}]   ;;  %s2788_s3 = inlined_call_operand.vmem [shape: f32[1,32], index: 3, kind: input, shape index: {}]   ;;  %s2789_s4 = inlined_call_operand.vmem [shape: f32[512,32], index: 4, kind: output, shape index: {}]  }
   0x1   :  { %s2267_s17 = smov 0  }
   0x2 LB: > { %s33_s18 = sadd.s32 1, %s2231_s16  ;;  %p1801_p0 = scmp.ge.s32.totalorder %s2235_s17, 1  ;;  %s2235_s17 = sphi %s2267_s17, %s14_s17   ;;  %s2231_s16 = sphi %s2265_s16, %s2791_s16   ;;  %s2227_s15 = sphi %s2263_s15, %s2790_s15  }
   0x3   : > { %p35_p1 = scmp.ge.s32.totalorder %s33_s18, 2  ;;  %p224_p2 = scmp.lt.s32.totalorder %s2235_s17, 3 }
   0x5   : > { %s2793_s18 = smov (%p35_p1, %s33_s18), 0  ;;  %p225_p3 = pnand %p1801_p0, %p224_p2 }
   0x6   : > { %s1802_s11 = sshll.u32 (!%p225_p3), %s2227_s15, 5 }
   0x7   : > { %228 = sbr.rel (%p225_p3) target bundleno = 396 (0x18c), region = 36  ;;  %p274_p4 = scmp.lt.s32.totalorder (!%p225_p3), %s1802_s11, 63 }
   0xc   : > { %v2087_v0 = vld [vmem:[%s2786_s1 + $0x78] sm:$0xff]   ;;  %v2237_v1 = vmov 0   ;;  %v2090_v4 = vld [vmem:[%s2786_s1 + $0x70] sm:$0xff]   ;;  %v2093_v7 = vld [vmem:[%s2786_s1 + $0x68] sm:$0xff]   ;;  %s2795_s11 = smov (!%p274_p4, %s1802_s11), 63  ;;  %vm917_vm0 = vcmask 785408  }
   0xd   : > { %2034 = vmatprep.subr.bf16.mxu1 %v2237_v1  ;;  %v2290_v2 = vld [vmem:[%s2786_s1 + $0xb8] sm:$0xff]   ;;  %1922 = vmatprep.subr.bf16.mxu0 %v2087_v0  ;;  %v2303_v5 = vld [vmem:[%s2786_s1 + $0xb0] sm:$0xff]   ;;  %v2315_v8 = vld [vmem:[%s2786_s1 + $0xa8] sm:$0xff]   ;;  %s1921_s5 = sshll.u32 %s2795_s11, 4  ;;  %s1806_s14 = sshll.u32 %s2795_s11, 3  ;;  %vm1292_vm1 = vcmask 261120  }
   0xe   : > { %v2089_v3 = vld [vmem:[%s2786_s1 + $0x38] sm:$0xff]   ;;  %2048 = vmatpush1.bf16.msra.mxu1 %v2290_v2  ;;  %v2092_v6 = vld [vmem:[%s2786_s1 + $0x30] sm:$0xff]   ;;  %v2095_v9 = vld [vmem:[%s2786_s1 + $0x28] sm:$0xff]   ;;  %s2375_s19 = scalar_lea.vmem %s2785_s0, %s1921_s5  ;;  %s2538_s21 = scalar_lea.vmem %s2789_s4, %s1806_s14 }
   0xf   : > { %1923 = vmatpush3.bf16.msra.mxu0 %v2089_v3  ;;  %2035 = vmatprep.subr.bf16.mxu1 %v2237_v1  ;;  %v2096_v10 = vld [vmem:[%s2786_s1 + $0x60] sm:$0xff]   ;;  %v2099_v13 = vld [vmem:[%s2786_s1 + $0x58] sm:$0xff]   ;;  %v2102_v16 = vld [vmem:[%s2786_s1 + $0x50] sm:$0xff]  }
  0x10   : > { %1924 = vmatprep.subr.bf16.mxu0 %v2090_v4  ;;  %v2329_v11 = vld [vmem:[%s2786_s1 + $0xa0] sm:$0xff]   ;;  %v2342_v14 = vld [vmem:[%s2786_s1 + $0x98] sm:$0xff]   ;;  %v2357_v17 = vld [vmem:[%s2786_s1 + $0x90] sm:$0xff]  }
  0x11   : > { %v2098_v12 = vld [vmem:[%s2786_s1 + $0x20] sm:$0xff]   ;;  %v2101_v15 = vld [vmem:[%s2786_s1 + $0x18] sm:$0xff]   ;;  %v2104_v18 = vld [vmem:[%s2786_s1 + $0x10] sm:$0xff]  }
  0x12   : > { %2049 = vmatpush1.bf16.msra.mxu1 %v2303_v5  ;;  %v2105_v19 = vld [vmem:[%s2786_s1 + $0x48] sm:$0xff]   ;;  %v2108_v22 = vld [vmem:[%s2786_s1 + $0x40] sm:$0xff]   ;;  %v2119_v32 = vld [vmem:[%s2786_s1 + $0xd8] sm:$0xff]  }
  0x13   : > { %1925 = vmatpush3.bf16.msra.mxu0 %v2092_v6  ;;  %2036 = vmatprep.subr.bf16.mxu1 %v2237_v1  ;;  %v2370_v20 = vld [vmem:[%s2786_s1 + $0x88] sm:$0xff]   ;;  %v2113_v23 = vld [vmem:[%s2375_s19 + $0x4] ss:$16 sps:$4 sm:$0xff]   ;;  %v2111_v26 = vld [vmem:[%s2375_s19] ss:$16 sps:$4 sm:$0xff]  }
  0x14   : > { %1926 = vmatprep.subr.bf16.mxu0 %v2093_v7  ;;  %v2107_v21 = vld [vmem:[%s2786_s1 + $0x8] sm:$0xff]   ;;  %v2390_v24 = vld [vmem:[%s2786_s1 + $0x80] sm:$0xff]   ;;  %998 = vmatprep.mubr.bf16.mxu0 %v2113_v23  ;;  %v2120_v34 = vld [vmem:[%s2786_s1 + $0xd0] sm:$0xff]  }
  0x15   : > { %v2110_v25 = vld [vmem:[%s2786_s1] sm:$0xff]   ;;  %v2401_v27 = vld [vmem:[%s2786_s1 + $0xe8] sm:$0xff]  }
  0x16   : > { %2050 = vmatpush1.bf16.msra.mxu1 %v2315_v8  ;;  %v2116_v28 = vld [vmem:[%s2375_s19 + $0x24] ss:$16 sps:$4 sm:$0xff]   ;;  %v2128_v30 = vld [vmem:[%s2375_s19 + $0x2c] ss:$16 sps:$4 sm:$0xff]   ;;  %v2118_v31 = vld [vmem:[%s2375_s19 + $0x20] ss:$16 sps:$4 sm:$0xff]  }
  0x17   : > { %1927 = vmatpush3.bf16.msra.mxu0 %v2095_v9  ;;  %2037 = vmatprep.subr.bf16.mxu1 %v2237_v1  ;;  %v2409_v29 = vld [vmem:[%s2786_s1 + $0xe0] sm:$0xff]   ;;  %v2124_v36 = vld [vmem:[%s2786_s1 + $0xc8] sm:$0xff]  }
  0x18   : > { %1928 = vmatprep.subr.bf16.mxu0 %v2096_v10  ;;  %1902 = vmatprep.mubr.msk.bf16.mxu1 %vm917_vm0, %v2128_v30  ;;  %v2121_v33 = vld [vmem:[%s2375_s19 + $0x44] ss:$16 sps:$4 sm:$0xff]   ;;  %v2123_v35 = vld [vmem:[%s2375_s19 + $0x40] ss:$16 sps:$4 sm:$0xff]   ;;  %v2126_v39 = vld [vmem:[%s2375_s19 + $0x28] ss:$16 sps:$4 sm:$0xff]  }
  0x19   : > { %v2129_v37 = vld [vmem:[%s2375_s19 + $0x64] ss:$16 sps:$4 sm:$0xff]   ;;  %v2131_v40 = vld [vmem:[%s2375_s19 + $0x60] ss:$16 sps:$4 sm:$0xff]   ;;  %v2132_v41 = vld [vmem:[%s2375_s19 + $0x4c] ss:$16 sps:$4 sm:$0xff]  }
  0x1a   : > { %2051 = vmatpush1.bf16.msra.mxu1 %v2329_v11  ;;  %v2125_v38 = vld [vmem:[%s2786_s1 + $0xc0] sm:$0xff]   ;;  %v2136_v43 = vld [vmem:[%s2375_s19 + $0x48] ss:$16 sps:$4 sm:$0xff]   ;;  %v2138_v45 = vld [vmem:[%s2375_s19 + $0x6c] ss:$16 sps:$4 sm:$0xff]  }
  0x1b   : > { %1929 = vmatpush3.bf16.msra.mxu0 %v2098_v12  ;;  %2038 = vmatprep.subr.bf16.mxu1 %v2237_v1  ;;  %v2134_v42 = vld [vmem:[%s2375_s19 + $0x84] ss:$16 sps:$4 sm:$0xff]   ;;  %v2137_v44 = vld [vmem:[%s2375_s19 + $0x80] ss:$16 sps:$4 sm:$0xff]   ;;  %v2142_v47 = vld [vmem:[%s2375_s19 + $0x68] ss:$16 sps:$4 sm:$0xff]  }
  0x1c   : > { %1930 = vmatprep.subr.bf16.mxu0 %v2099_v13  ;;  %v2140_v46 = vld [vmem:[%s2375_s19 + $0xa4] ss:$16 sps:$4 sm:$0xff]   ;;  %v2143_v48 = vld [vmem:[%s2375_s19 + $0xa0] ss:$16 sps:$4 sm:$0xff]   ;;  %v2144_v49 = vld [vmem:[%s2375_s19 + $0x8c] ss:$16 sps:$4 sm:$0xff]  }
  0x1d   : > { %v2146_v50 = vld [vmem:[%s2375_s19 + $0xc4] ss:$16 sps:$4 sm:$0xff]   ;;  %v2148_v51 = vld [vmem:[%s2375_s19 + $0x88] ss:$16 sps:$4 sm:$0xff]   ;;  %v2149_v52 = vld [vmem:[%s2375_s19 + $0xc0] ss:$16 sps:$4 sm:$0xff]  }
  0x1e   : > { %2052 = vmatpush1.bf16.msra.mxu1 %v2342_v14  ;;  %v2150_v53 = vld [vmem:[%s2375_s19 + $0xac] ss:$16 sps:$4 sm:$0xff]   ;;  %v2152_v54 = vld [vmem:[%s2375_s19 + $0xe4] ss:$16 sps:$4 sm:$0xff]   ;;  %v2154_v55 = vld [vmem:[%s2375_s19 + $0xa8] ss:$16 sps:$4 sm:$0xff]  }
  0x1f   : > { %1931 = vmatpush3.bf16.msra.mxu0 %v2101_v15  ;;  %2039 = vmatprep.subr.bf16.mxu1 %v2237_v1  ;;  %v2155_v56 = vld [vmem:[%s2375_s19 + $0xe0] ss:$16 sps:$4 sm:$0xff]   ;;  %v2156_v57 = vld [vmem:[%s2375_s19 + $0xcc] ss:$16 sps:$4 sm:$0xff]   ;;  %v2158_v58 = vld [vmem:[%s2375_s19 + $0x104] ss:$16 sps:$4 sm:$0xff]  }
  0x20   : > { %1932 = vmatprep.subr.bf16.mxu0 %v2102_v16  ;;  %v2160_v59 = vld [vmem:[%s2375_s19 + $0xc8] ss:$16 sps:$4 sm:$0xff]   ;;  %v2161_v60 = vld [vmem:[%s2375_s19 + $0x100] ss:$16 sps:$4 sm:$0xff]   ;;  %v2162_v61 = vld [vmem:[%s2375_s19 + $0xec] ss:$16 sps:$4 sm:$0xff]  }
  0x21   : > { %v2164_v62 = vld [vmem:[%s2375_s19 + $0x124] ss:$16 sps:$4 sm:$0xff]   ;;  %v2166_v63 = vld [vmem:[%s2375_s19 + $0xe8] ss:$16 sps:$4 sm:$0xff]   ;;  %v2167_v0 = vld [vmem:[%s2375_s19 + $0x120] ss:$16 sps:$4 sm:$0xff]  }
  0x22   : > { %2053 = vmatpush1.bf16.msra.mxu1 %v2357_v17  ;;  %v2172_v3 = vld [vmem:[%s2375_s19 + $0x108] ss:$16 sps:$4 sm:$0xff]   ;;  %v2173_v4 = vld [vmem:[%s2375_s19 + $0x140] ss:$16 sps:$4 sm:$0xff]   ;;  %v2176_v6 = vld [vmem:[%s2375_s19 + $0x164] ss:$16 sps:$4 sm:$0xff]  }
  0x23   : > { %1933 = vmatpush3.bf16.msra.mxu0 %v2104_v18  ;;  %2040 = vmatprep.subr.bf16.mxu1 %v2237_v1  ;;  %v2178_v7 = vld [vmem:[%s2375_s19 + $0x128] ss:$16 sps:$4 sm:$0xff]   ;;  %v2180_v9 = vld [vmem:[%s2375_s19 + $0x14c] ss:$16 sps:$4 sm:$0xff]   ;;  %v2182_v10 = vld [vmem:[%s2375_s19 + $0x184] ss:$16 sps:$4 sm:$0xff]  }
  0x24   : > { %1934 = vmatprep.subr.bf16.mxu0 %v2105_v19  ;;  %v2185_v12 = vld [vmem:[%s2375_s19 + $0x180] ss:$16 sps:$4 sm:$0xff]   ;;  %v2186_v13 = vld [vmem:[%s2375_s19 + $0x16c] ss:$16 sps:$4 sm:$0xff]   ;;  %v2190_v15 = vld [vmem:[%s2375_s19 + $0x168] ss:$16 sps:$4 sm:$0xff]  }
  0x25   : > { %v2191_v16 = vld [vmem:[%s2375_s19 + $0x1a0] ss:$16 sps:$4 sm:$0xff]   ;;  %v2194_v18 = vld [vmem:[%s2375_s19 + $0x1c4] ss:$16 sps:$4 sm:$0xff]   ;;  %v2196_v19 = vld [vmem:[%s2375_s19 + $0x188] ss:$16 sps:$4 sm:$0xff]  }
  0x26   : > { %2054 = vmatpush1.bf16.msra.mxu1 %v2370_v20  ;;  %v2202_v23 = vld [vmem:[%s2375_s19 + $0x1a8] ss:$16 sps:$4 sm:$0xff]  }
  0x27   : > { %1935 = vmatpush3.bf16.msra.mxu0 %v2107_v21  ;;  %2041 = vmatprep.subr.bf16.mxu1 %v2237_v1  ;;  %v2198_v21 = vld [vmem:[%s2375_s19 + $0x1ac] ss:$16 sps:$4 sm:$0xff]   ;;  %v2212_v30 = vld [vmem:[%s2375_s19 + $0x1e8] ss:$16 sps:$4 sm:$0xff]  }
  0x28   : > { %1936 = vmatprep.subr.bf16.mxu0 %v2108_v22  ;;  %v2200_v22 = vld [vmem:[%s2375_s19 + $0x1e4] ss:$16 sps:$4 sm:$0xff]  }
  0x2a   : > { %2055 = vmatpush1.bf16.msra.mxu1 %v2390_v24 }
  0x2b   : > { %1937 = vmatpush3.bf16.msra.mxu0 %v2110_v25  ;;  %2042 = vmatprep.subr.bf16.mxu1 %v2237_v1  ;;  %v2204_v25 = vld [vmem:[%s2375_s19 + $0x1cc] ss:$16 sps:$4 sm:$0xff]  }
  0x2c   : > { %1127 = vmatprep.subr.bf16.mxu0 %v2237_v1 }
  0x2e   : > { %999 = vmatmul.mubr.bf16.vlgmr.msra.gmra.mxu0 %v2111_v26  ;;  %2056 = vmatpush2.bf16.msra.mxu1 %v2401_v27  ;;  %v2208_v26 = vld [vmem:[%s2375_s19 + $0xc] ss:$16 sps:$4 sm:$0xff]  }
  0x2f   : > { %2043 = vmatprep.subr.bf16.mxu1 %v2237_v1  ;;  %1006 = vmatprep.mubr.bf16.mxu0 %v2116_v28  ;;  %v2206_v28 = vld [vmem:[%s2375_s19 + $0x8] ss:$16 sps:$4 sm:$0xff]  }
  0x30   : > { %1128 = vmatpush1.bf16.msra.mxu0 %v2290_v2  ;;  %v2170_v2 = vld [vmem:[%s2375_s19 + $0x144] ss:$16 sps:$4 sm:$0xff]  }
  0x31   : > { %1129 = vmatprep.subr.bf16.mxu0 %v2237_v1 }
  0x32   : > { %2057 = vmatpush2.bf16.msra.mxu1 %v2409_v29 }
  0x33   : > { %2044 = vmatprep.subr.bf16.mxu1 %v2237_v1 }
  0x34   : > { %1130 = vmatpush1.bf16.msra.mxu0 %v2303_v5  ;;  %v2174_v5 = vld [vmem:[%s2375_s19 + $0x12c] ss:$16 sps:$4 sm:$0xff]  }
  0x35   : > { %1131 = vmatprep.subr.bf16.mxu0 %v2237_v1 }
  0x36   : > { %1007 = vmatmul.mubr.bf16.gmra.mxu0 %v2118_v31  ;;  %2058 = vmatpush2.bf16.msra.mxu1 %v2119_v32 }
  0x37   : > { %2045 = vmatprep.subr.bf16.mxu1 %v2237_v1  ;;  %1014 = vmatprep.mubr.bf16.mxu0 %v2121_v33 }
  0x38   : > { %1132 = vmatpush1.bf16.msra.mxu0 %v2315_v8  ;;  %v2179_v8 = vld [vmem:[%s2375_s19 + $0x160] ss:$16 sps:$4 sm:$0xff]  }
  0x39   : > { %1133 = vmatprep.subr.bf16.mxu0 %v2237_v1 }
  0x3a   : > { %2059 = vmatpush2.bf16.msra.mxu1 %v2120_v34 }
  0x3b   : > { %2046 = vmatprep.subr.bf16.mxu1 %v2237_v1 }
  0x3c   : > { %1134 = vmatpush1.bf16.msra.mxu0 %v2329_v11  ;;  %v2184_v11 = vld [vmem:[%s2375_s19 + $0x148] ss:$16 sps:$4 sm:$0xff]  }
  0x3d   : > { %1135 = vmatprep.subr.bf16.mxu0 %v2237_v1 }
  0x3e   : > { %1015 = vmatmul.mubr.bf16.gmra.mxu0 %v2123_v35  ;;  %2060 = vmatpush2.bf16.msra.mxu1 %v2124_v36 }
  0x3f   : > { %2047 = vmatprep.subr.bf16.mxu1 %v2237_v1  ;;  %1022 = vmatprep.mubr.bf16.mxu0 %v2129_v37 }
  0x40   : > { %1136 = vmatpush1.bf16.msra.mxu0 %v2342_v14  ;;  %v2188_v14 = vld [vmem:[%s2375_s19 + $0x1a4] ss:$16 sps:$4 sm:$0xff]  }
  0x41   : > { %1137 = vmatprep.subr.bf16.mxu0 %v2237_v1 }
  0x42   : > { %2061 = vmatpush2.bf16.msra.mxu1 %v2125_v38 }
  0x44   : > { %1138 = vmatpush1.bf16.msra.mxu0 %v2357_v17  ;;  %v2192_v17 = vld [vmem:[%s2375_s19 + $0x18c] ss:$16 sps:$4 sm:$0xff]  }
  0x45   : > { %1168 = vmatmul.mubr.bf16.vlgmr.msra.gmra.mxu1 %v2126_v39  ;;  %1139 = vmatprep.subr.bf16.mxu0 %v2237_v1 }
  0x46   : > { %1023 = vmatmul.mubr.bf16.gmra.mxu0 %v2131_v40  ;;  %1903 = vmatprep.mubr.msk.bf16.mxu1 %vm917_vm0, %v2132_v41 }
  0x47   : > { %1030 = vmatprep.mubr.bf16.mxu0 %v2134_v42 }
  0x48   : > { %1140 = vmatpush1.bf16.msra.mxu0 %v2370_v20  ;;  %v2197_v20 = vld [vmem:[%s2375_s19 + $0x1c0] ss:$16 sps:$4 sm:$0xff]  }
  0x49   : > { %1141 = vmatprep.subr.bf16.mxu0 %v2237_v1 }
  0x4c   : > { %1142 = vmatpush1.bf16.msra.mxu0 %v2390_v24  ;;  %v2203_v24 = vld [vmem:[%s2375_s19 + $0x1e0] ss:$16 sps:$4 sm:$0xff]  }
  0x4d   : > { %1176 = vmatmul.mubr.bf16.gmra.mxu1 %v2136_v43  ;;  %1147 = vmatprep.subr.bf16.mxu0 %v2237_v1 }
  0x4e   : > { %1031 = vmatmul.mubr.bf16.gmra.mxu0 %v2137_v44  ;;  %1904 = vmatprep.mubr.msk.bf16.mxu1 %vm917_vm0, %v2138_v45 }
  0x4f   : > { %1038 = vmatprep.mubr.bf16.mxu0 %v2140_v46 }
  0x50   : > { %1148 = vmatpush2.bf16.msra.mxu0 %v2401_v27  ;;  %v2209_v27 = vld [vmem:[%s2375_s19 + $0x1c8] ss:$16 sps:$4 sm:$0xff]  }
  0x51   : > { %1149 = vmatprep.subr.bf16.mxu0 %v2237_v1 }
  0x54   : > { %1150 = vmatpush2.bf16.msra.mxu0 %v2409_v29  ;;  %v2210_v29 = vld [vmem:[%s2375_s19 + $0x1ec] ss:$16 sps:$4 sm:$0xff]  }
  0x55   : > { %1184 = vmatmul.mubr.bf16.gmra.mxu1 %v2142_v47  ;;  %1151 = vmatprep.subr.bf16.mxu0 %v2237_v1 }
  0x56   : > { %1039 = vmatmul.mubr.bf16.gmra.mxu0 %v2143_v48  ;;  %1905 = vmatprep.mubr.msk.bf16.mxu1 %vm917_vm0, %v2144_v49 }
  0x57   : > { %1046 = vmatprep.mubr.bf16.mxu0 %v2146_v50 }
  0x58   : > { %1152 = vmatpush2.bf16.msra.mxu0 %v2119_v32 }
  0x59   : > { %1153 = vmatprep.subr.bf16.mxu0 %v2237_v1 }
  0x5c   : > { %1154 = vmatpush2.bf16.msra.mxu0 %v2120_v34 }
  0x5d   : > { %1192 = vmatmul.mubr.bf16.gmra.mxu1 %v2148_v51  ;;  %1155 = vmatprep.subr.bf16.mxu0 %v2237_v1 }
  0x5e   : > { %1047 = vmatmul.mubr.bf16.gmra.mxu0 %v2149_v52  ;;  %1906 = vmatprep.mubr.msk.bf16.mxu1 %vm917_vm0, %v2150_v53 }
  0x5f   : > { %1054 = vmatprep.mubr.bf16.mxu0 %v2152_v54 }
  0x60   : > { %1156 = vmatpush2.bf16.msra.mxu0 %v2124_v36 }
  0x61   : > { %1157 = vmatprep.subr.bf16.mxu0 %v2237_v1  ;;  %v2168_v1 = vld [vmem:[%s2375_s19 + $0x10c] ss:$16 sps:$4 sm:$0xff]  }
  0x64   : > { %1158 = vmatpush2.bf16.msra.mxu0 %v2125_v38 }
  0x65   : > { %1200 = vmatmul.mubr.bf16.gmra.mxu1 %v2154_v55 }
  0x66   : > { %1055 = vmatmul.mubr.bf16.gmra.mxu0 %v2155_v56  ;;  %1907 = vmatprep.mubr.msk.bf16.mxu1 %vm917_vm0, %v2156_v57 }
  0x67   : > { %1062 = vmatprep.mubr.bf16.mxu0 %v2158_v58  ;;  %v2547_v58 = vld [vmem:[%s2787_s2] ss:$0 sm:$0xff] }
  0x6d   : > { %1208 = vmatmul.mubr.bf16.gmra.mxu1 %v2160_v59 }
  0x6e   : > { %1063 = vmatmul.mubr.bf16.gmra.mxu0 %v2161_v60  ;;  %1908 = vmatprep.mubr.msk.bf16.mxu1 %vm917_vm0, %v2162_v61 }
  0x6f   : > { %1070 = vmatprep.mubr.bf16.mxu0 %v2164_v62 }
  0x75   : > { %1216 = vmatmul.mubr.bf16.gmra.mxu1 %v2166_v63  ;;  %v2553_v63 = vld [vmem:[%s2788_s3] ss:$0 sm:$0xff] }
  0x76   : > { %1071 = vmatmul.mubr.bf16.gmra.mxu0 %v2167_v0  ;;  %1909 = vmatprep.mubr.msk.bf16.mxu1 %vm917_vm0, %v2168_v1 }
  0x77   : > { %1078 = vmatprep.mubr.bf16.mxu0 %v2170_v2 }
  0x7d   : > { %1224 = vmatmul.mubr.bf16.gmra.mxu1 %v2172_v3 }
  0x7e   : > { %1079 = vmatmul.mubr.bf16.gmra.mxu0 %v2173_v4  ;;  %1910 = vmatprep.mubr.msk.bf16.mxu1 %vm917_vm0, %v2174_v5 }
  0x7f   : > { %1086 = vmatprep.mubr.bf16.mxu0 %v2176_v6 }
  0x85   : > { %1232 = vmatmul.mubr.bf16.gmra.mxu1 %v2178_v7 }
  0x86   : > { %1087 = vmatmul.mubr.bf16.gmra.mxu0 %v2179_v8  ;;  %1911 = vmatprep.mubr.msk.bf16.mxu1 %vm917_vm0, %v2180_v9 }
  0x87   : > { %1094 = vmatprep.mubr.bf16.mxu0 %v2182_v10 }
  0x8d   : > { %1240 = vmatmul.mubr.bf16.gmra.mxu1 %v2184_v11 }
  0x8e   : > { %1095 = vmatmul.mubr.bf16.gmra.mxu0 %v2185_v12  ;;  %1912 = vmatprep.mubr.msk.bf16.mxu1 %vm917_vm0, %v2186_v13 }
  0x8f   : > { %1102 = vmatprep.mubr.bf16.mxu0 %v2188_v14 }
  0x95   : > { %1248 = vmatmul.mubr.bf16.gmra.mxu1 %v2190_v15 }
  0x96   : > { %1103 = vmatmul.mubr.bf16.gmra.mxu0 %v2191_v16  ;;  %1913 = vmatprep.mubr.msk.bf16.mxu1 %vm917_vm0, %v2192_v17 }
  0x97   : > { %1110 = vmatprep.mubr.bf16.mxu0 %v2194_v18 }
  0x9d   : > { %1256 = vmatmul.mubr.bf16.gmra.mxu1 %v2196_v19 }
  0x9e   : > { %1111 = vmatmul.mubr.bf16.gmra.mxu0 %v2197_v20  ;;  %1914 = vmatprep.mubr.msk.bf16.mxu1 %vm917_vm0, %v2198_v21 }
  0x9f   : > { %1118 = vmatprep.mubr.bf16.mxu0 %v2200_v22 }
  0xa5   : > { %1264 = vmatmul.mubr.bf16.gmra.mxu1 %v2202_v23 }
  0xa6   : > { %1119 = vmatmul.mubr.bf16.gmra.mxu0 %v2203_v24  ;;  %1915 = vmatprep.mubr.msk.bf16.mxu1 %vm917_vm0, %v2204_v25 }
  0xa7   : > { %1901 = vmatprep.mubr.msk.bf16.mxu0 %vm917_vm0, %v2208_v26 }
  0xad   : > { %1272 = vmatmul.mubr.bf16.gmra.mxu1 %v2209_v27 }
  0xae   : > { %1160 = vmatmul.mubr.bf16.vlgmr.msra.gmra.mxu0 %v2206_v28  ;;  %1916 = vmatprep.mubr.msk.bf16.mxu1 %vm917_vm0, %v2210_v29 }
  0xb5   : > { %1280 = vmatmul.mubr.bf16.gmra.mxu1 %v2212_v30 }
  0xee   : > { %v1938_v31 = vpop.f32.mrf.mxu0 }
  0xf0   : > { %v1939_v32 = vpop.f32.mrf.mxu0 }
  0xf1   : > { %v2530_v33 = vadd.f32 %v1939_v32, %v1938_v31 }
  0xf2   : > { %v1941_v34 = vpop.f32.mrf.mxu0 }
  0xf4   : > { %v1942_v35 = vpop.f32.mrf.mxu0 }
  0xf5   : > { %v2532_v36 = vadd.f32 %v1942_v35, %v1941_v34 }
  0xf6   : > { %v1944_v37 = vpop.f32.mrf.mxu0 }
  0xf8   : > { %v1945_v38 = vpop.f32.mrf.mxu0 }
  0xf9   : > { %v1946_v44 = vadd.f32 %v1945_v38, %v1944_v37 }
  0xfa   : > { %v1947_v39 = vpop.f32.mrf.mxu0 }
  0xfc   : > { %v1948_v40 = vpop.f32.mrf.mxu0 }
  0xfd   : > { %v1949_v50 = vadd.f32 %v1948_v40, %v1947_v39 }
  0xfe   : > { %v1950_v41 = vpop.f32.mrf.mxu0 }
 0x100   : > { %v1951_v42 = vpop.f32.mrf.mxu0 }
 0x101   : > { %v1952_v56 = vadd.f32 %v1951_v42, %v1950_v41 }
 0x102   : > { %v1953_v43 = vpop.f32.mrf.mxu0 }
 0x104   : > { %v1954_v45 = vpop.f32.mrf.mxu0 }
 0x105   : > { %v1169_v46 = vpop.f32.mrf.mxu1  ;;  %v1955_v1 = vadd.f32 %v1954_v45, %v1953_v43 }
 0x106   : > { %v1170_v47 = vadd.f32 %v1946_v44, %v1169_v46  ;;  %v1956_v48 = vpop.f32.mrf.mxu0 }
 0x107   : > { %v1171_v49 = vpop.f32.mrf.mxu1 }
 0x108   : > { %1295 = vst.msk [vmem:[%s2538_s21 + $0x10] sm:$0xff] %vm1292_vm1, %v1170_v47  ;;  %v1957_v51 = vpop.f32.mrf.mxu0 }
 0x109   : > { %v1172_v52 = vpop.f32.mrf.mxu1  ;;  %v1958_v11 = vadd.f32 %v1957_v51, %v1956_v48 }
 0x10a   : > { %v1173_v53 = vadd.f32 %v1949_v50, %v1172_v52  ;;  %v1959_v54 = vpop.f32.mrf.mxu0 }
 0x10b   : > { %v1174_v55 = vpop.f32.mrf.mxu1 }
 0x10c   : > { %1296 = vst.msk [vmem:[%s2538_s21 + $0x18] sm:$0xff] %vm1292_vm1, %v1173_v53  ;;  %v1960_v57 = vpop.f32.mrf.mxu0 }
 0x10d   : > { %v1177_v59 = vpop.f32.mrf.mxu1  ;;  %v1961_v22 = vadd.f32 %v1960_v57, %v1959_v54 }
 0x10e   : > { %v1178_v60 = vadd.f32 %v1952_v56, %v1177_v59  ;;  %v1962_v61 = vpop.f32.mrf.mxu0 }
 0x10f   : > { %v1431_v62 = vld [vmem:[%s2538_s21 + $0x10] sm:$0xff]  ;;  %v1179_v0 = vpop.f32.mrf.mxu1 }
 0x110   : > { %v1470_v2 = vmul.f32 %v2547_v58, %v1431_v62  ;;  %1297 = vst.msk [vmem:[%s2538_s21 + $0x20] sm:$0xff] %vm1292_vm1, %v1178_v60  ;;  %v1963_v3 = vpop.f32.mrf.mxu0 }
 0x111   : > { %v1180_v4 = vpop.f32.mrf.mxu1  ;;  %v1964_v34 = vadd.f32 %v1963_v3, %v1962_v61 }
 0x112   : > { %v1509_v5 = vadd.f32 %v2553_v63, %v1470_v2  ;;  %v1181_v6 = vadd.f32 %v1955_v1, %v1180_v4  ;;  %v1965_v7 = vpop.f32.mrf.mxu0 }
 0x113   : > { %v1432_v8 = vld [vmem:[%s2538_s21 + $0x18] sm:$0xff]  ;;  %v1182_v9 = vpop.f32.mrf.mxu1 }
 0x114   : > { %vm1541_vm2 = vcmp.ge.f32.partialorder %v1509_v5, 0.0  ;;  %v1573_v10 = vmul.f32 0.01, %v1509_v5  ;;  %v1471_v12 = vmul.f32 %v2547_v58, %v1432_v8  ;;  %1298 = vst.msk [vmem:[%s2538_s21 + $0x28] sm:$0xff] %vm1292_vm1, %v1181_v6  ;;  %v1966_v13 = vpop.f32.mrf.mxu0 }
 0x115   : > { %v1185_v14 = vpop.f32.mrf.mxu1  ;;  %v1967_v46 = vadd.f32 %v1966_v13, %v1965_v7 }
 0x116   : > { %v1605_v15 = vsel %vm1541_vm2, %v1509_v5, %v1573_v10  ;;  %v1510_v16 = vadd.f32 %v2553_v63, %v1471_v12  ;;  %v1186_v17 = vadd.f32 %v1958_v11, %v1185_v14  ;;  %v1968_v18 = vpop.f32.mrf.mxu0 }
 0x117   : > { %1638 = vst.msk [vmem:[%s2538_s21 + $0x10] sm:$0xff] %vm1292_vm1, %v1605_v15  ;;  %v1433_v19 = vld [vmem:[%s2538_s21 + $0x20] sm:$0xff]  ;;  %v1187_v20 = vpop.f32.mrf.mxu1 }
 0x118   : > { %vm1542_vm3 = vcmp.ge.f32.partialorder %v1510_v16, 0.0  ;;  %v1574_v21 = vmul.f32 0.01, %v1510_v16  ;;  %v1472_v23 = vmul.f32 %v2547_v58, %v1433_v19  ;;  %1299 = vst.msk [vmem:[%s2538_s21 + $0x30] sm:$0xff] %vm1292_vm1, %v1186_v17  ;;  %v1969_v24 = vpop.f32.mrf.mxu0 }
 0x119   : > { %v1188_v25 = vpop.f32.mrf.mxu1  ;;  %v1970_v57 = vadd.f32 %v1969_v24, %v1968_v18 }
 0x11a   : > { %v1606_v26 = vsel %vm1542_vm3, %v1510_v16, %v1574_v21  ;;  %v1511_v27 = vadd.f32 %v2553_v63, %v1472_v23  ;;  %v1189_v28 = vadd.f32 %v1961_v22, %v1188_v25  ;;  %v1971_v29 = vpop.f32.mrf.mxu0 }
 0x11b   : > { %1639 = vst.msk [vmem:[%s2538_s21 + $0x18] sm:$0xff] %vm1292_vm1, %v1606_v26  ;;  %v1434_v30 = vld [vmem:[%s2538_s21 + $0x28] sm:$0xff]  ;;  %v1190_v31 = vpop.f32.mrf.mxu1 }
 0x11c   : > { %vm1543_vm4 = vcmp.ge.f32.partialorder %v1511_v27, 0.0  ;;  %v1575_v32 = vmul.f32 0.01, %v1511_v27  ;;  %v1473_v35 = vmul.f32 %v2547_v58, %v1434_v30  ;;  %1300 = vst.msk [vmem:[%s2538_s21 + $0x38] sm:$0xff] %vm1292_vm1, %v1189_v28  ;;  %v1972_v37 = vpop.f32.mrf.mxu0 }
 0x11d   : > { %v1193_v38 = vpop.f32.mrf.mxu1  ;;  %v1973_v6 = vadd.f32 %v1972_v37, %v1971_v29 }
 0x11e   : > { %v1607_v39 = vsel %vm1543_vm4, %v1511_v27, %v1575_v32  ;;  %v1512_v40 = vadd.f32 %v2553_v63, %v1473_v35  ;;  %v1194_v41 = vadd.f32 %v1964_v34, %v1193_v38  ;;  %v1974_v42 = vpop.f32.mrf.mxu0 }
 0x11f   : > { %1640 = vst.msk [vmem:[%s2538_s21 + $0x20] sm:$0xff] %vm1292_vm1, %v1607_v39  ;;  %v1435_v43 = vld [vmem:[%s2538_s21 + $0x30] sm:$0xff]  ;;  %v1195_v44 = vpop.f32.mrf.mxu1 }
 0x120   : > { %vm1544_vm5 = vcmp.ge.f32.partialorder %v1512_v40, 0.0  ;;  %v1576_v45 = vmul.f32 0.01, %v1512_v40  ;;  %v1474_v47 = vmul.f32 %v2547_v58, %v1435_v43  ;;  %1301 = vst.msk [vmem:[%s2538_s21 + $0x40] sm:$0xff] %vm1292_vm1, %v1194_v41  ;;  %v1975_v48 = vpop.f32.mrf.mxu0 }
 0x121   : > { %v1196_v49 = vpop.f32.mrf.mxu1  ;;  %v1976_v17 = vadd.f32 %v1975_v48, %v1974_v42 }
 0x122   : > { %v1608_v50 = vsel %vm1544_vm5, %v1512_v40, %v1576_v45  ;;  %v1513_v51 = vadd.f32 %v2553_v63, %v1474_v47  ;;  %v1197_v52 = vadd.f32 %v1967_v46, %v1196_v49  ;;  %v1977_v53 = vpop.f32.mrf.mxu0 }
 0x123   : > { %1641 = vst.msk [vmem:[%s2538_s21 + $0x28] sm:$0xff] %vm1292_vm1, %v1608_v50  ;;  %v1436_v54 = vld [vmem:[%s2538_s21 + $0x38] sm:$0xff]  ;;  %v1198_v55 = vpop.f32.mrf.mxu1 }
 0x124   : > { %vm1545_vm6 = vcmp.ge.f32.partialorder %v1513_v51, 0.0  ;;  %v1577_v56 = vmul.f32 0.01, %v1513_v51  ;;  %v1475_v59 = vmul.f32 %v2547_v58, %v1436_v54  ;;  %1302 = vst.msk [vmem:[%s2538_s21 + $0x48] sm:$0xff] %vm1292_vm1, %v1197_v52  ;;  %v1978_v60 = vpop.f32.mrf.mxu0 }
 0x125   : > { %v1201_v61 = vpop.f32.mrf.mxu1  ;;  %v1979_v28 = vadd.f32 %v1978_v60, %v1977_v53 }
 0x126   : > { %v1609_v62 = vsel %vm1545_vm6, %v1513_v51, %v1577_v56  ;;  %v1514_v0 = vadd.f32 %v2553_v63, %v1475_v59  ;;  %v1202_v1 = vadd.f32 %v1970_v57, %v1201_v61  ;;  %v1980_v2 = vpop.f32.mrf.mxu0 }
 0x127   : > { %1642 = vst.msk [vmem:[%s2538_s21 + $0x30] sm:$0xff] %vm1292_vm1, %v1609_v62  ;;  %v1437_v3 = vld [vmem:[%s2538_s21 + $0x40] sm:$0xff]  ;;  %v1203_v4 = vpop.f32.mrf.mxu1 }
 0x128   : > { %vm1546_vm7 = vcmp.ge.f32.partialorder %v1514_v0, 0.0  ;;  %v1578_v5 = vmul.f32 0.01, %v1514_v0  ;;  %v1476_v7 = vmul.f32 %v2547_v58, %v1437_v3  ;;  %1303 = vst.msk [vmem:[%s2538_s21 + $0x50] sm:$0xff] %vm1292_vm1, %v1202_v1  ;;  %v1981_v8 = vpop.f32.mrf.mxu0 }
 0x129   : > { %v1204_v9 = vpop.f32.mrf.mxu1  ;;  %v1982_v41 = vadd.f32 %v1981_v8, %v1980_v2 }
 0x12a   : > { %v1610_v10 = vsel %vm1546_vm7, %v1514_v0, %v1578_v5  ;;  %v1515_v11 = vadd.f32 %v2553_v63, %v1476_v7  ;;  %v1205_v12 = vadd.f32 %v1973_v6, %v1204_v9  ;;  %v1983_v13 = vpop.f32.mrf.mxu0 }
 0x12b   : > { %1643 = vst.msk [vmem:[%s2538_s21 + $0x38] sm:$0xff] %vm1292_vm1, %v1610_v10  ;;  %v1438_v14 = vld [vmem:[%s2538_s21 + $0x48] sm:$0xff]  ;;  %v1206_v15 = vpop.f32.mrf.mxu1 }
 0x12c   : > { %vm1547_vm8 = vcmp.ge.f32.partialorder %v1515_v11, 0.0  ;;  %v1579_v16 = vmul.f32 0.01, %v1515_v11  ;;  %v1477_v18 = vmul.f32 %v2547_v58, %v1438_v14  ;;  %1304 = vst.msk [vmem:[%s2538_s21 + $0x58] sm:$0xff] %vm1292_vm1, %v1205_v12  ;;  %v1984_v19 = vpop.f32.mrf.mxu0 }
 0x12d   : > { %v1209_v20 = vpop.f32.mrf.mxu1  ;;  %v1985_v52 = vadd.f32 %v1984_v19, %v1983_v13 }
 0x12e   : > { %v1611_v21 = vsel %vm1547_vm8, %v1515_v11, %v1579_v16  ;;  %v1516_v22 = vadd.f32 %v2553_v63, %v1477_v18  ;;  %v1210_v23 = vadd.f32 %v1976_v17, %v1209_v20  ;;  %v1986_v24 = vpop.f32.mrf.mxu0 }
 0x12f   : > { %1644 = vst.msk [vmem:[%s2538_s21 + $0x40] sm:$0xff] %vm1292_vm1, %v1611_v21  ;;  %v1439_v25 = vld [vmem:[%s2538_s21 + $0x50] sm:$0xff]  ;;  %v1211_v26 = vpop.f32.mrf.mxu1 }
 0x130   : > { %vm1548_vm9 = vcmp.ge.f32.partialorder %v1516_v22, 0.0  ;;  %v1580_v27 = vmul.f32 0.01, %v1516_v22  ;;  %v1478_v29 = vmul.f32 %v2547_v58, %v1439_v25  ;;  %1305 = vst.msk [vmem:[%s2538_s21 + $0x60] sm:$0xff] %vm1292_vm1, %v1210_v23  ;;  %v1987_v30 = vpop.f32.mrf.mxu0 }
 0x131   : > { %v1212_v31 = vpop.f32.mrf.mxu1  ;;  %v1988_v1 = vadd.f32 %v1987_v30, %v1986_v24 }
 0x132   : > { %v1612_v32 = vsel %vm1548_vm9, %v1516_v22, %v1580_v27  ;;  %v1517_v34 = vadd.f32 %v2553_v63, %v1478_v29  ;;  %v1213_v35 = vadd.f32 %v1979_v28, %v1212_v31  ;;  %v1989_v37 = vpop.f32.mrf.mxu0 }
 0x133   : > { %1645 = vst.msk [vmem:[%s2538_s21 + $0x48] sm:$0xff] %vm1292_vm1, %v1612_v32  ;;  %v1440_v38 = vld [vmem:[%s2538_s21 + $0x58] sm:$0xff]  ;;  %v1214_v39 = vpop.f32.mrf.mxu1 }
 0x134   : > { %vm1549_vm10 = vcmp.ge.f32.partialorder %v1517_v34, 0.0  ;;  %v1581_v40 = vmul.f32 0.01, %v1517_v34  ;;  %v1479_v42 = vmul.f32 %v2547_v58, %v1440_v38  ;;  %1306 = vst.msk [vmem:[%s2538_s21 + $0x68] sm:$0xff] %vm1292_vm1, %v1213_v35  ;;  %v1990_v43 = vpop.f32.mrf.mxu0 }
 0x135   : > { %v1217_v44 = vpop.f32.mrf.mxu1  ;;  %v1991_v12 = vadd.f32 %v1990_v43, %v1989_v37 }
 0x136   : > { %v1613_v45 = vsel %vm1549_vm10, %v1517_v34, %v1581_v40  ;;  %v1518_v46 = vadd.f32 %v2553_v63, %v1479_v42  ;;  %v1218_v47 = vadd.f32 %v1982_v41, %v1217_v44  ;;  %v1992_v48 = vpop.f32.mrf.mxu0 }
 0x137   : > { %1646 = vst.msk [vmem:[%s2538_s21 + $0x50] sm:$0xff] %vm1292_vm1, %v1613_v45  ;;  %v1441_v49 = vld [vmem:[%s2538_s21 + $0x60] sm:$0xff]  ;;  %v1219_v50 = vpop.f32.mrf.mxu1 }
 0x138   : > { %vm1550_vm11 = vcmp.ge.f32.partialorder %v1518_v46, 0.0  ;;  %v1582_v51 = vmul.f32 0.01, %v1518_v46  ;;  %v1480_v53 = vmul.f32 %v2547_v58, %v1441_v49  ;;  %1307 = vst.msk [vmem:[%s2538_s21 + $0x70] sm:$0xff] %vm1292_vm1, %v1218_v47  ;;  %v1993_v54 = vpop.f32.mrf.mxu0 }
 0x139   : > { %v1220_v55 = vpop.f32.mrf.mxu1  ;;  %v1994_v23 = vadd.f32 %v1993_v54, %v1992_v48 }
 0x13a   : > { %v1614_v56 = vsel %vm1550_vm11, %v1518_v46, %v1582_v51  ;;  %v1519_v57 = vadd.f32 %v2553_v63, %v1480_v53  ;;  %v1221_v59 = vadd.f32 %v1985_v52, %v1220_v55  ;;  %v1995_v60 = vpop.f32.mrf.mxu0 }
 0x13b   : > { %1647 = vst.msk [vmem:[%s2538_s21 + $0x58] sm:$0xff] %vm1292_vm1, %v1614_v56  ;;  %v1442_v61 = vld [vmem:[%s2538_s21 + $0x68] sm:$0xff]  ;;  %v1222_v62 = vpop.f32.mrf.mxu1 }
 0x13c   : > { %vm1551_vm12 = vcmp.ge.f32.partialorder %v1519_v57, 0.0  ;;  %v1583_v0 = vmul.f32 0.01, %v1519_v57  ;;  %v1481_v2 = vmul.f32 %v2547_v58, %v1442_v61  ;;  %1308 = vst.msk [vmem:[%s2538_s21 + $0x78] sm:$0xff] %vm1292_vm1, %v1221_v59  ;;  %v1996_v3 = vpop.f32.mrf.mxu0 }
 0x13d   : > { %v1225_v4 = vpop.f32.mrf.mxu1  ;;  %v1997_v35 = vadd.f32 %v1996_v3, %v1995_v60 }
 0x13e   : > { %v1615_v5 = vsel %vm1551_vm12, %v1519_v57, %v1583_v0  ;;  %v1520_v6 = vadd.f32 %v2553_v63, %v1481_v2  ;;  %v1226_v7 = vadd.f32 %v1988_v1, %v1225_v4  ;;  %v1998_v8 = vpop.f32.mrf.mxu0 }
 0x13f   : > { %1648 = vst.msk [vmem:[%s2538_s21 + $0x60] sm:$0xff] %vm1292_vm1, %v1615_v5  ;;  %v1443_v9 = vld [vmem:[%s2538_s21 + $0x70] sm:$0xff]  ;;  %v1227_v10 = vpop.f32.mrf.mxu1 }
 0x140   : > { %vm1552_vm13 = vcmp.ge.f32.partialorder %v1520_v6, 0.0  ;;  %v1584_v11 = vmul.f32 0.01, %v1520_v6  ;;  %v1482_v13 = vmul.f32 %v2547_v58, %v1443_v9  ;;  %1309 = vst.msk [vmem:[%s2538_s21 + $0x80] sm:$0xff] %vm1292_vm1, %v1226_v7  ;;  %v1999_v14 = vpop.f32.mrf.mxu0 }
 0x141   : > { %v1228_v15 = vpop.f32.mrf.mxu1  ;;  %v2000_v47 = vadd.f32 %v1999_v14, %v1998_v8 }
 0x142   : > { %v1616_v16 = vsel %vm1552_vm13, %v1520_v6, %v1584_v11  ;;  %v1521_v17 = vadd.f32 %v2553_v63, %v1482_v13  ;;  %v1229_v18 = vadd.f32 %v1991_v12, %v1228_v15  ;;  %v2001_v19 = vpop.f32.mrf.mxu0 }
 0x143   : > { %1649 = vst.msk [vmem:[%s2538_s21 + $0x68] sm:$0xff] %vm1292_vm1, %v1616_v16  ;;  %v1444_v20 = vld [vmem:[%s2538_s21 + $0x78] sm:$0xff]  ;;  %v1230_v21 = vpop.f32.mrf.mxu1 }
 0x144   : > { %vm1553_vm14 = vcmp.ge.f32.partialorder %v1521_v17, 0.0  ;;  %v1585_v22 = vmul.f32 0.01, %v1521_v17  ;;  %v1483_v24 = vmul.f32 %v2547_v58, %v1444_v20  ;;  %1310 = vst.msk [vmem:[%s2538_s21 + $0x88] sm:$0xff] %vm1292_vm1, %v1229_v18  ;;  %v2002_v25 = vpop.f32.mrf.mxu0 }
 0x145   : > { %v1233_v26 = vpop.f32.mrf.mxu1  ;;  %v2003_v59 = vadd.f32 %v2002_v25, %v2001_v19 }
 0x146   : > { %v1617_v27 = vsel %vm1553_vm14, %v1521_v17, %v1585_v22  ;;  %v1522_v28 = vadd.f32 %v2553_v63, %v1483_v24  ;;  %v1234_v29 = vadd.f32 %v1994_v23, %v1233_v26  ;;  %v2004_v30 = vpop.f32.mrf.mxu0 }
 0x147   : > { %1650 = vst.msk [vmem:[%s2538_s21 + $0x70] sm:$0xff] %vm1292_vm1, %v1617_v27  ;;  %v1445_v31 = vld [vmem:[%s2538_s21 + $0x80] sm:$0xff]  ;;  %v1235_v32 = vpop.f32.mrf.mxu1 }
 0x148   : > { %vm1554_vm15 = vcmp.ge.f32.partialorder %v1522_v28, 0.0  ;;  %v1586_v34 = vmul.f32 0.01, %v1522_v28  ;;  %v1484_v37 = vmul.f32 %v2547_v58, %v1445_v31  ;;  %1311 = vst.msk [vmem:[%s2538_s21 + $0x90] sm:$0xff] %vm1292_vm1, %v1234_v29  ;;  %v2005_v38 = vpop.f32.mrf.mxu0 }
 0x149   : > { %v1236_v39 = vpop.f32.mrf.mxu1  ;;  %v2006_v7 = vadd.f32 %v2005_v38, %v2004_v30 }
 0x14a   : > { %v1618_v40 = vsel %vm1554_vm15, %v1522_v28, %v1586_v34  ;;  %v1523_v41 = vadd.f32 %v2553_v63, %v1484_v37  ;;  %v1237_v42 = vadd.f32 %v1997_v35, %v1236_v39  ;;  %v2007_v43 = vpop.f32.mrf.mxu0 }
 0x14b   : > { %1651 = vst.msk [vmem:[%s2538_s21 + $0x78] sm:$0xff] %vm1292_vm1, %v1618_v40  ;;  %v1446_v44 = vld [vmem:[%s2538_s21 + $0x88] sm:$0xff]  ;;  %v1238_v45 = vpop.f32.mrf.mxu1 }
 0x14c   : > { %vm1555_vm0 = vcmp.ge.f32.partialorder %v1523_v41, 0.0  ;;  %v1587_v46 = vmul.f32 0.01, %v1523_v41  ;;  %v1485_v48 = vmul.f32 %v2547_v58, %v1446_v44  ;;  %1312 = vst.msk [vmem:[%s2538_s21 + $0x98] sm:$0xff] %vm1292_vm1, %v1237_v42  ;;  %v2008_v49 = vpop.f32.mrf.mxu0 }
 0x14d   : > { %v1241_v50 = vpop.f32.mrf.mxu1  ;;  %v2009_v18 = vadd.f32 %v2008_v49, %v2007_v43 }
 0x14e   : > { %v1619_v51 = vsel %vm1555_vm0, %v1523_v41, %v1587_v46  ;;  %v1524_v52 = vadd.f32 %v2553_v63, %v1485_v48  ;;  %v1242_v53 = vadd.f32 %v2000_v47, %v1241_v50  ;;  %v2010_v54 = vpop.f32.mrf.mxu0 }
 0x14f   : > { %1652 = vst.msk [vmem:[%s2538_s21 + $0x80] sm:$0xff] %vm1292_vm1, %v1619_v51  ;;  %v1447_v55 = vld [vmem:[%s2538_s21 + $0x90] sm:$0xff]  ;;  %v1243_v56 = vpop.f32.mrf.mxu1 }
 0x150   : > { %vm1556_vm2 = vcmp.ge.f32.partialorder %v1524_v52, 0.0  ;;  %v1588_v57 = vmul.f32 0.01, %v1524_v52  ;;  %v1486_v60 = vmul.f32 %v2547_v58, %v1447_v55  ;;  %1313 = vst.msk [vmem:[%s2538_s21 + $0xa0] sm:$0xff] %vm1292_vm1, %v1242_v53  ;;  %v2011_v61 = vpop.f32.mrf.mxu0 }
 0x151   : > { %v1244_v62 = vpop.f32.mrf.mxu1  ;;  %v2012_v29 = vadd.f32 %v2011_v61, %v2010_v54 }
 0x152   : > { %v1620_v0 = vsel %vm1556_vm2, %v1524_v52, %v1588_v57  ;;  %v1525_v1 = vadd.f32 %v2553_v63, %v1486_v60  ;;  %v1245_v2 = vadd.f32 %v2003_v59, %v1244_v62  ;;  %v2013_v3 = vpop.f32.mrf.mxu0 }
 0x153   : > { %1653 = vst.msk [vmem:[%s2538_s21 + $0x88] sm:$0xff] %vm1292_vm1, %v1620_v0  ;;  %v1448_v4 = vld [vmem:[%s2538_s21 + $0x98] sm:$0xff]  ;;  %v1246_v5 = vpop.f32.mrf.mxu1 }
 0x154   : > { %vm1557_vm3 = vcmp.ge.f32.partialorder %v1525_v1, 0.0  ;;  %v1589_v6 = vmul.f32 0.01, %v1525_v1  ;;  %v1487_v8 = vmul.f32 %v2547_v58, %v1448_v4  ;;  %1314 = vst.msk [vmem:[%s2538_s21 + $0xa8] sm:$0xff] %vm1292_vm1, %v1245_v2  ;;  %v2014_v9 = vpop.f32.mrf.mxu0 }
 0x155   : > { %v1249_v10 = vpop.f32.mrf.mxu1  ;;  %v2015_v42 = vadd.f32 %v2014_v9, %v2013_v3 }
 0x156   : > { %v1621_v11 = vsel %vm1557_vm3, %v1525_v1, %v1589_v6  ;;  %v1526_v12 = vadd.f32 %v2553_v63, %v1487_v8  ;;  %v1250_v13 = vadd.f32 %v2006_v7, %v1249_v10  ;;  %v2016_v14 = vpop.f32.mrf.mxu0 }
 0x157   : > { %1654 = vst.msk [vmem:[%s2538_s21 + $0x90] sm:$0xff] %vm1292_vm1, %v1621_v11  ;;  %v1449_v15 = vld [vmem:[%s2538_s21 + $0xa0] sm:$0xff]  ;;  %v1251_v16 = vpop.f32.mrf.mxu1 }
 0x158   : > { %vm1558_vm4 = vcmp.ge.f32.partialorder %v1526_v12, 0.0  ;;  %v1590_v17 = vmul.f32 0.01, %v1526_v12  ;;  %v1488_v19 = vmul.f32 %v2547_v58, %v1449_v15  ;;  %1315 = vst.msk [vmem:[%s2538_s21 + $0xb0] sm:$0xff] %vm1292_vm1, %v1250_v13  ;;  %v2017_v20 = vpop.f32.mrf.mxu0 }
 0x159   : > { %v1252_v21 = vpop.f32.mrf.mxu1  ;;  %v2018_v53 = vadd.f32 %v2017_v20, %v2016_v14 }
 0x15a   : > { %v1622_v22 = vsel %vm1558_vm4, %v1526_v12, %v1590_v17  ;;  %v1527_v23 = vadd.f32 %v2553_v63, %v1488_v19  ;;  %v1253_v24 = vadd.f32 %v2009_v18, %v1252_v21  ;;  %v2019_v25 = vpop.f32.mrf.mxu0 }
 0x15b   : > { %1655 = vst.msk [vmem:[%s2538_s21 + $0x98] sm:$0xff] %vm1292_vm1, %v1622_v22  ;;  %v1450_v26 = vld [vmem:[%s2538_s21 + $0xa8] sm:$0xff]  ;;  %v1254_v27 = vpop.f32.mrf.mxu1 }
 0x15c   : > { %vm1559_vm5 = vcmp.ge.f32.partialorder %v1527_v23, 0.0  ;;  %v1591_v28 = vmul.f32 0.01, %v1527_v23  ;;  %v1489_v30 = vmul.f32 %v2547_v58, %v1450_v26  ;;  %1316 = vst.msk [vmem:[%s2538_s21 + $0xb8] sm:$0xff] %vm1292_vm1, %v1253_v24  ;;  %v2020_v31 = vpop.f32.mrf.mxu0 }
 0x15d   : > { %v1257_v32 = vpop.f32.mrf.mxu1  ;;  %v2021_v2 = vadd.f32 %v2020_v31, %v2019_v25 }
 0x15e   : > { %v1623_v34 = vsel %vm1559_vm5, %v1527_v23, %v1591_v28  ;;  %v1528_v35 = vadd.f32 %v2553_v63, %v1489_v30  ;;  %v1258_v37 = vadd.f32 %v2012_v29, %v1257_v32  ;;  %v2022_v38 = vpop.f32.mrf.mxu0 }
 0x15f   : > { %1656 = vst.msk [vmem:[%s2538_s21 + $0xa0] sm:$0xff] %vm1292_vm1, %v1623_v34  ;;  %v1451_v39 = vld [vmem:[%s2538_s21 + $0xb0] sm:$0xff]  ;;  %v1259_v40 = vpop.f32.mrf.mxu1 }
 0x160   : > { %vm1560_vm6 = vcmp.ge.f32.partialorder %v1528_v35, 0.0  ;;  %v1592_v41 = vmul.f32 0.01, %v1528_v35  ;;  %v1490_v43 = vmul.f32 %v2547_v58, %v1451_v39  ;;  %1317 = vst.msk [vmem:[%s2538_s21 + $0xc0] sm:$0xff] %vm1292_vm1, %v1258_v37  ;;  %v2023_v44 = vpop.f32.mrf.mxu0 }
 0x161   : > { %v1260_v45 = vpop.f32.mrf.mxu1  ;;  %v2024_v13 = vadd.f32 %v2023_v44, %v2022_v38 }
 0x162   : > { %v1624_v46 = vsel %vm1560_vm6, %v1528_v35, %v1592_v41  ;;  %v1529_v47 = vadd.f32 %v2553_v63, %v1490_v43  ;;  %v1261_v48 = vadd.f32 %v2015_v42, %v1260_v45  ;;  %v2025_v49 = vpop.f32.mrf.mxu0 }
 0x163   : > { %1657 = vst.msk [vmem:[%s2538_s21 + $0xa8] sm:$0xff] %vm1292_vm1, %v1624_v46  ;;  %v1452_v50 = vld [vmem:[%s2538_s21 + $0xb8] sm:$0xff]  ;;  %v1262_v51 = vpop.f32.mrf.mxu1 }
 0x164   : > { %vm1561_vm7 = vcmp.ge.f32.partialorder %v1529_v47, 0.0  ;;  %v1593_v52 = vmul.f32 0.01, %v1529_v47  ;;  %v1491_v54 = vmul.f32 %v2547_v58, %v1452_v50  ;;  %1318 = vst.msk [vmem:[%s2538_s21 + $0xc8] sm:$0xff] %vm1292_vm1, %v1261_v48  ;;  %v2026_v55 = vpop.f32.mrf.mxu0 }
 0x165   : > { %v1265_v56 = vpop.f32.mrf.mxu1  ;;  %v2027_v25 = vadd.f32 %v2026_v55, %v2025_v49 }
 0x166   : > { %v1625_v57 = vsel %vm1561_vm7, %v1529_v47, %v1593_v52  ;;  %v1530_v59 = vadd.f32 %v2553_v63, %v1491_v54  ;;  %v1266_v60 = vadd.f32 %v2018_v53, %v1265_v56  ;;  %v2028_v61 = vpop.f32.mrf.mxu0 }
 0x167   : > { %1658 = vst.msk [vmem:[%s2538_s21 + $0xb0] sm:$0xff] %vm1292_vm1, %v1625_v57  ;;  %v1453_v62 = vld [vmem:[%s2538_s21 + $0xc0] sm:$0xff]  ;;  %v1267_v0 = vpop.f32.mrf.mxu1 }
 0x168   : > { %vm1562_vm8 = vcmp.ge.f32.partialorder %v1530_v59, 0.0  ;;  %v1594_v1 = vmul.f32 0.01, %v1530_v59  ;;  %v1492_v3 = vmul.f32 %v2547_v58, %v1453_v62  ;;  %1319 = vst.msk [vmem:[%s2538_s21 + $0xd0] sm:$0xff] %vm1292_vm1, %v1266_v60  ;;  %v2029_v4 = vpop.f32.mrf.mxu0 }
 0x169   : > { %v1268_v5 = vpop.f32.mrf.mxu1  ;;  %v2030_v38 = vadd.f32 %v2029_v4, %v2028_v61 }
 0x16a   : > { %v1626_v6 = vsel %vm1562_vm8, %v1530_v59, %v1594_v1  ;;  %v1531_v7 = vadd.f32 %v2553_v63, %v1492_v3  ;;  %v1269_v8 = vadd.f32 %v2021_v2, %v1268_v5  ;;  %v2031_v9 = vpop.f32.mrf.mxu0 }
 0x16b   : > { %1659 = vst.msk [vmem:[%s2538_s21 + $0xb8] sm:$0xff] %vm1292_vm1, %v1626_v6  ;;  %v1454_v10 = vld [vmem:[%s2538_s21 + $0xc8] sm:$0xff]  ;;  %v1270_v11 = vpop.f32.mrf.mxu1 }
 0x16c   : > { %vm1563_vm9 = vcmp.ge.f32.partialorder %v1531_v7, 0.0  ;;  %v1595_v12 = vmul.f32 0.01, %v1531_v7  ;;  %v1493_v14 = vmul.f32 %v2547_v58, %v1454_v10  ;;  %1320 = vst.msk [vmem:[%s2538_s21 + $0xd8] sm:$0xff] %vm1292_vm1, %v1269_v8  ;;  %v2032_v15 = vpop.f32.mrf.mxu0 }
 0x16d   : > { %v1273_v16 = vpop.f32.mrf.mxu1  ;;  %v2033_v47 = vadd.f32 %v2032_v15, %v2031_v9 }
 0x16e   : > { %v1627_v17 = vsel %vm1563_vm9, %v1531_v7, %v1595_v12  ;;  %v1532_v18 = vadd.f32 %v2553_v63, %v1493_v14  ;;  %v1274_v19 = vadd.f32 %v2024_v13, %v1273_v16  ;;  %v1161_v20 = vpop.f32.mrf.mxu0 }
 0x16f   : > { %1660 = vst.msk [vmem:[%s2538_s21 + $0xc0] sm:$0xff] %vm1292_vm1, %v1627_v17  ;;  %v1455_v21 = vld [vmem:[%s2538_s21 + $0xd0] sm:$0xff]  ;;  %v1162_v22 = vadd.f32 %v2530_v33, %v1161_v20  ;;  %v1275_v23 = vpop.f32.mrf.mxu1 }
 0x170   : > { %vm1564_vm10 = vcmp.ge.f32.partialorder %v1532_v18, 0.0  ;;  %v1596_v24 = vmul.f32 0.01, %v1532_v18  ;;  %v1494_v26 = vmul.f32 %v2547_v58, %v1455_v21  ;;  %1321 = vst.msk [vmem:[%s2538_s21 + $0xe0] sm:$0xff] %vm1292_vm1, %v1274_v19  ;;  %v1163_v27 = vpop.f32.mrf.mxu0 }
 0x171   : > { %1293 = vst.msk [vmem:[%s2538_s21] sm:$0xff] %vm1292_vm1, %v1162_v22  ;;  %v1276_v28 = vpop.f32.mrf.mxu1 }
 0x172   : > { %v1628_v29 = vsel %vm1564_vm10, %v1532_v18, %v1596_v24  ;;  %v1533_v30 = vadd.f32 %v2553_v63, %v1494_v26  ;;  %v1277_v31 = vadd.f32 %v2027_v25, %v1276_v28  ;;  %v1164_v32 = vpop.f32.mrf.mxu0 }
 0x173   : > { %1661 = vst.msk [vmem:[%s2538_s21 + $0xc8] sm:$0xff] %vm1292_vm1, %v1628_v29  ;;  %v1456_v33 = vld [vmem:[%s2538_s21 + $0xd8] sm:$0xff]  ;;  %v1165_v34 = vadd.f32 %v2532_v36, %v1164_v32  ;;  %v1278_v35 = vpop.f32.mrf.mxu1 }
 0x174   : > { %vm1565_vm11 = vcmp.ge.f32.partialorder %v1533_v30, 0.0  ;;  %v1597_v37 = vmul.f32 0.01, %v1533_v30  ;;  %v1495_v39 = vmul.f32 %v2547_v58, %v1456_v33  ;;  %1322 = vst.msk [vmem:[%s2538_s21 + $0xe8] sm:$0xff] %vm1292_vm1, %v1277_v31  ;;  %v1166_v40 = vpop.f32.mrf.mxu0 }
 0x175   : > { %1294 = vst.msk [vmem:[%s2538_s21 + $0x8] sm:$0xff] %vm1292_vm1, %v1165_v34  ;;  %v1281_v41 = vpop.f32.mrf.mxu1 }
 0x176   : > { %v1629_v42 = vsel %vm1565_vm11, %v1533_v30, %v1597_v37  ;;  %v1534_v43 = vadd.f32 %v2553_v63, %v1495_v39  ;;  %v1282_v44 = vadd.f32 %v2030_v38, %v1281_v41 }
 0x177   : > { %1662 = vst.msk [vmem:[%s2538_s21 + $0xd0] sm:$0xff] %vm1292_vm1, %v1629_v42  ;;  %v1457_v36 = vld [vmem:[%s2538_s21 + $0xe0] sm:$0xff]  ;;  %v1283_v45 = vpop.f32.mrf.mxu1 }
 0x178   : > { %vm1566_vm12 = vcmp.ge.f32.partialorder %v1534_v43, 0.0  ;;  %v1598_v46 = vmul.f32 0.01, %v1534_v43  ;;  %v1496_v48 = vmul.f32 %v2547_v58, %v1457_v36  ;;  %v1429_v49 = vld [vmem:[%s2538_s21] sm:$0xff]  ;;  %1323 = vst.msk [vmem:[%s2538_s21 + $0xf0] sm:$0xff] %vm1292_vm1, %v1282_v44 }
 0x179   : > { %v1468_v50 = vmul.f32 %v2547_v58, %v1429_v49  ;;  %v1284_v51 = vpop.f32.mrf.mxu1 }
 0x17a   : > { %v1630_v52 = vsel %vm1566_vm12, %v1534_v43, %v1598_v46  ;;  %v1535_v53 = vadd.f32 %v2553_v63, %v1496_v48  ;;  %v1285_v54 = vadd.f32 %v2033_v47, %v1284_v51 }
 0x17b   : > { %1663 = vst.msk [vmem:[%s2538_s21 + $0xd8] sm:$0xff] %vm1292_vm1, %v1630_v52  ;;  %v1507_v55 = vadd.f32 %v2553_v63, %v1468_v50  ;;  %v1458_v56 = vld [vmem:[%s2538_s21 + $0xe8] sm:$0xff]  ;;  %v1286_v57 = vpop.f32.mrf.mxu1 }
 0x17c   : > { %vm1567_vm13 = vcmp.ge.f32.partialorder %v1535_v53, 0.0  ;;  %v1599_v59 = vmul.f32 0.01, %v1535_v53  ;;  %v1497_v60 = vmul.f32 %v2547_v58, %v1458_v56  ;;  %v1430_v61 = vld [vmem:[%s2538_s21 + $0x8] sm:$0xff]  ;;  %1324 = vst.msk [vmem:[%s2538_s21 + $0xf8] sm:$0xff] %vm1292_vm1, %v1285_v54 }
 0x17d   : > { %vm1539_vm14 = vcmp.ge.f32.partialorder %v1507_v55, 0.0  ;;  %v1571_v62 = vmul.f32 0.01, %v1507_v55  ;;  %v1469_v0 = vmul.f32 %v2547_v58, %v1430_v61 }
 0x17e   : > { %v1631_v1 = vsel %vm1567_vm13, %v1535_v53, %v1599_v59  ;;  %v1536_v2 = vadd.f32 %v2553_v63, %v1497_v60 }
 0x17f   : > { %1664 = vst.msk [vmem:[%s2538_s21 + $0xe0] sm:$0xff] %vm1292_vm1, %v1631_v1  ;;  %v1603_v3 = vsel %vm1539_vm14, %v1507_v55, %v1571_v62  ;;  %v1508_v4 = vadd.f32 %v2553_v63, %v1469_v0  ;;  %v1459_v5 = vld [vmem:[%s2538_s21 + $0xf0] sm:$0xff] }
 0x180   : > { %1636 = vst.msk [vmem:[%s2538_s21] sm:$0xff] %vm1292_vm1, %v1603_v3  ;;  %vm1568_vm15 = vcmp.ge.f32.partialorder %v1536_v2, 0.0  ;;  %v1600_v6 = vmul.f32 0.01, %v1536_v2  ;;  %v1498_v7 = vmul.f32 %v2547_v58, %v1459_v5 }
 0x181   : > { %vm1540_vm0 = vcmp.ge.f32.partialorder %v1508_v4, 0.0  ;;  %v1572_v8 = vmul.f32 0.01, %v1508_v4 }
 0x182   : > { %v1632_v9 = vsel %vm1568_vm15, %v1536_v2, %v1600_v6  ;;  %v1537_v10 = vadd.f32 %v2553_v63, %v1498_v7 }
 0x183   : > { %1665 = vst.msk [vmem:[%s2538_s21 + $0xe8] sm:$0xff] %vm1292_vm1, %v1632_v9  ;;  %v1604_v11 = vsel %vm1540_vm0, %v1508_v4, %v1572_v8  ;;  %v1460_v12 = vld [vmem:[%s2538_s21 + $0xf8] sm:$0xff] }
 0x184   : > { %1637 = vst.msk [vmem:[%s2538_s21 + $0x8] sm:$0xff] %vm1292_vm1, %v1604_v11  ;;  %vm1569_vm2 = vcmp.ge.f32.partialorder %v1537_v10, 0.0  ;;  %v1601_v13 = vmul.f32 0.01, %v1537_v10  ;;  %v1499_v14 = vmul.f32 %v2547_v58, %v1460_v12 }
 0x186   : > { %v1633_v15 = vsel %vm1569_vm2, %v1537_v10, %v1601_v13  ;;  %v1538_v16 = vadd.f32 %v2553_v63, %v1499_v14 }
 0x187   : > { %1666 = vst.msk [vmem:[%s2538_s21 + $0xf0] sm:$0xff] %vm1292_vm1, %v1633_v15 }
 0x188   : > { %vm1570_vm3 = vcmp.ge.f32.partialorder %v1538_v16, 0.0  ;;  %v1602_v17 = vmul.f32 0.01, %v1538_v16 }
 0x18a   : > { %v1634_v18 = vsel %vm1570_vm3, %v1538_v16, %v1602_v17 }
 0x18b   : > { %1667 = vst.msk [vmem:[%s2538_s21 + $0xf8] sm:$0xff] %vm1292_vm1, %v1634_v18 }
 0x18c PF: > { %s14_s17 = sadd.s32 1, %s2235_s17   ;;  %s2790_s15 = smov %s2231_s16 }
 0x18d   : > { %p11_p5 = scmp.ge.s32.totalorder %s14_s17, 4   ;;  %s2791_s16 = smov %s2793_s18 }
 0x18f   :  { %13 = sbr.rel (!%p11_p5) target bundleno = 2 (0x2), region = 87 }

</bundles_post_ra>
